<compile_context>
chip_gen: v5e
topology: v5e:2x2
jax: 0.10.0
libtpu: 0.0.40
codegen_flags: <defaults>
</compile_context>

<pallas_src>
import functools

import jax
import jax.numpy as jnp
from jax.experimental import pallas as pl
from jax.experimental.pallas import tpu as pltpu


def _round_up(x, m):
    return (x + m - 1) // m * m


# ---------------------------------------------------------------------------
# Prologue: per-node work (node_fc, att scaling, fused Wa1/Wa2 projection).
# Tiled over node rows only; weights are tiny and ride along as full blocks.
# ---------------------------------------------------------------------------
def _node_prologue_kernel(h_ref, att_ref, wn_ref, bn_ref, wcat_ref, ba_ref,
                          ahw2_ref, base_ref, *, dpo):
    h1 = jnp.dot(h_ref[...], wn_ref[...],
                 preferred_element_type=jnp.float32) + bn_ref[...]
    ah = att_ref[...] * h1
    # One fused MXU call (K = 2*dpi) using the block-diagonal stacked weight:
    #   [h1 | ah] @ [[Wa1, 0], [0, Wa2]] = [h1 @ Wa1 | ah @ Wa2]
    proj = jnp.dot(jnp.concatenate([h1, ah], axis=1), wcat_ref[...],
                   preferred_element_type=jnp.float32)
    base_ref[...] = proj[:, :dpo] + ba_ref[...]
    # bf16 storage -> native-rate MXU matmul and half the HBM traffic in the
    # N^2 aggregation (ahw2 is re-streamed once per output row tile).
    ahw2_ref[...] = proj[:, dpo:].astype(jnp.bfloat16)


# ---------------------------------------------------------------------------
# Main: out[i] = relu(base[i] + sum_k adj_t[i,k] @ ahw2[k] + indeg[i]*ahw2[i])
# Grid = (row tiles "parallel", source-column tiles "arbitrary").
# ---------------------------------------------------------------------------
def _aggregate_kernel(adjt_ref, ahw2k_ref, base_ref, ahw2i_ref, out_ref, deg_ref):
    k = pl.program_id(1)

    @pl.when(k == 0)
    def _():
        out_ref[...] = base_ref[...]
        deg_ref[...] = jnp.zeros_like(deg_ref)

    # Native bf16 x bf16 MXU matmul, f32 accumulation directly into the
    # resident output block (its index_map is independent of k).
    out_ref[...] += jnp.dot(adjt_ref[...], ahw2k_ref[...],
                            preferred_element_type=jnp.float32)
    # In-kernel in-degree: running row-sum of the 0/1 adjacency tile (exact).
    # Cross-lane reduce runs on the XLU/VPU and hides under the MXU matmul.
    deg_ref[...] += jnp.sum(adjt_ref[...].astype(jnp.float32), axis=1,
                            keepdims=True)

    @pl.when(k == pl.num_programs(1) - 1)
    def _():
        out_ref[...] = jnp.maximum(
            out_ref[...] + deg_ref[...] * ahw2i_ref[...].astype(jnp.float32),
            0.0)                                             # F.relu


def fact_gcn_forward(h, att, adj_t, w_node, b_node, w_apply, b_apply,
                     *, tile_m=512, tile_k=2048):
    """FactGCNLayer forward.

    h      : (N, Din)   node features                  (ndata['h'])
    att    : (N, 1)     per-node attention scalar      (ndata['att'])
    adj_t  : (N, N)     TRANSPOSED adjacency: adj_t[v, u] = 1 iff edge u -> v.
                        Pass it in bf16 (0/1 is exact) to avoid any wrapper-side
                        N^2 cast/transpose pass.
    w_node : (Din, Din) torch nn.Linear layout (out, in);  w_apply: (Dout, 2*Din)
    """
    N, din = h.shape
    dout = w_apply.shape[0]
    f32 = jnp.float32

    # ---- per-axis padding (no lcm blow-up) -----------------------------------
    n128 = _round_up(N, 128)
    tm = min(_round_up(min(tile_m, n128), 128), n128)    # dest-row tile
    tk = min(_round_up(min(tile_k, n128), 128), n128)    # src-col tile
    mpad = _round_up(N, tm)        # rows of adj_t / base / out
    kpad = _round_up(N, tk)        # cols of adj_t / rows of ahw2 slab
    npad = max(mpad, kpad)         # per-node feature arrays cover both uses
    dpi = _round_up(din, 128)
    dpo = _round_up(dout, 128)

    h_p = jnp.zeros((npad, dpi), f32).at[:N, :din].set(h.astype(f32))
    att_p = jnp.zeros((npad, 1), f32).at[:N].set(att.astype(f32))

    # 0/1 adjacency -> bf16 is exact; cast is a no-op if the caller already
    # provides bf16, and padding is skipped when N is already tile-aligned.
    adjt_bf16 = adj_t.astype(jnp.bfloat16)
    if adjt_bf16.shape != (mpad, kpad):
        adjt_bf16 = jnp.zeros((mpad, kpad), jnp.bfloat16).at[:N, :N].set(adjt_bf16)

    wn_p = jnp.zeros((dpi, dpi), f32).at[:din, :din].set(w_node.T.astype(f32))
    bn_p = jnp.zeros((1, dpi), f32).at[0, :din].set(b_node.astype(f32))
    wa_t = w_apply.T.astype(f32)                              # (2*Din, Dout)
    # block-diagonal stacked weight for the single fused prologue projection
    wcat = (jnp.zeros((2 * dpi, 2 * dpo), f32)
            .at[:din, :dout].set(wa_t[:din])                  # Wa1 (applied to h1)
            .at[dpi:dpi + din, dpo:dpo + dout].set(wa_t[din:]))  # Wa2 (applied to ah)
    ba_p = jnp.zeros((1, dpo), f32).at[0, :dout].set(b_apply.astype(f32))

    # prologue row tile: one grid step for small N, otherwise up to 2048 rows
    if npad <= 2048:
        tp = npad
    else:
        tp = max(c for c in (128, 256, 512, 1024, 2048) if npad % c == 0)

    row = lambda i: (i, 0)
    whole = lambda i: (0, 0)
    cparams = dict(vmem_limit_bytes=48 * 1024 * 1024)   # > v5e 16 MiB default,
                                                        # < v7x 64 MiB physical

    # ---- prologue pallas_call -------------------------------------------------
    ahw2, base = pl.pallas_call(
        functools.partial(_node_prologue_kernel, dpo=dpo),
        grid=(npad // tp,),
        out_shape=(jax.ShapeDtypeStruct((npad, dpo), jnp.bfloat16),   # ahw2
                   jax.ShapeDtypeStruct((npad, dpo), f32)),           # base
        in_specs=[pl.BlockSpec((tp, dpi), row),
                  pl.BlockSpec((tp, 1), row),
                  pl.BlockSpec((dpi, dpi), whole),
                  pl.BlockSpec((1, dpi), whole),
                  pl.BlockSpec((2 * dpi, 2 * dpo), whole),
                  pl.BlockSpec((1, dpo), whole)],
        out_specs=(pl.BlockSpec((tp, dpo), row),
                   pl.BlockSpec((tp, dpo), row)),
        compiler_params=pltpu.CompilerParams(
            dimension_semantics=("parallel",), **cparams),
    )(h_p, att_p, wn_p, bn_p, wcat, ba_p)

    # ---- main tiled aggregation pallas_call ------------------------------------
    # Note: if a profile still shows the adjacency DMA exposed, add
    # pipeline_mode=pl.Buffered(3) on the adj_t BlockSpec (VMEM headroom allows).
    out_p = pl.pallas_call(
        _aggregate_kernel,
        grid=(mpad // tm, kpad // tk),
        out_shape=jax.ShapeDtypeStruct((mpad, dpo), f32),
        in_specs=[pl.BlockSpec((tm, tk), lambda i, k: (i, k)),    # adj_t tile (bf16)
                  pl.BlockSpec((tk, dpo), lambda i, k: (k, 0)),   # ahw2 source slab
                  pl.BlockSpec((tm, dpo), lambda i, k: (i, 0)),   # base  (resident)
                  pl.BlockSpec((tm, dpo), lambda i, k: (i, 0))],  # ahw2 dest rows
        out_specs=pl.BlockSpec((tm, dpo), lambda i, k: (i, 0)),   # resident acc/out
        scratch_shapes=[pltpu.VMEM((tm, 1), f32)],                # running in-degree
        compiler_params=pltpu.CompilerParams(
            dimension_semantics=("parallel", "arbitrary"), **cparams),
    )(adjt_bf16, ahw2, base, ahw2)

    return out_p[:N, :dout]


if __name__ == "__main__":
    key = jax.random.PRNGKey(0)
    # deliberately non-MXU-aligned feature sizes to exercise the padding path
    N, in_dim, out_dim = 384, 96, 80
    k1, k2, k3, k4, k5, k6, k7 = jax.random.split(key, 7)

    # graph data: adjacency constructed directly in transposed bf16 form,
    # adj_t[v, u] = 1 iff edge u -> v  (caller-side prep per the perf review)
    h = jax.random.normal(k1, (N, in_dim), jnp.float32)          # ndata['h']
    att = jax.random.uniform(k2, (N, 1), jnp.float32)            # ndata['att']
    adj_t = (jax.random.uniform(k3, (N, N)) < 0.3).astype(jnp.bfloat16)

    # PyTorch nn.Linear default init: U(-1/sqrt(fan_in), 1/sqrt(fan_in))
    bn_ = 1.0 / (in_dim ** 0.5)
    w_node = jax.random.uniform(k4, (in_dim, in_dim), jnp.float32, -bn_, bn_)
    b_node = jax.random.uniform(k5, (in_dim,), jnp.float32, -bn_, bn_)
    ba_ = 1.0 / ((2 * in_dim) ** 0.5)
    w_apply = jax.random.uniform(k6, (out_dim, 2 * in_dim), jnp.float32, -ba_, ba_)
    b_apply = jax.random.uniform(k7, (out_dim,), jnp.float32, -ba_, ba_)

    out = fact_gcn_forward(h, att, adj_t, w_node, b_node, w_apply, b_apply)
    out = jax.block_until_ready(out)

    # pure-JAX f32 reference (adjacency reconstructed in the original u->v layout)
    adj = adj_t.T.astype(jnp.float32)
    h1 = h @ w_node.T + b_node
    ah = att * h1
    indeg = adj.sum(axis=0).reshape(N, 1)
    h_sum = adj.T @ ah + indeg * ah
    ref = jax.nn.relu(jnp.concatenate([h1, h_sum], axis=1) @ w_apply.T + b_apply)

    assert out.shape == (N, out_dim)
    # ahw2 is stored in bf16 for native MXU aggregation -> ~2^-9 relative
    # quantization on the aggregated term; tolerance loosened accordingly.
    assert jnp.allclose(out, ref, atol=5e-2, rtol=2e-2), "mismatch vs reference"

    print("KERNEL_OK")
</pallas_src>

<mosaic_0001>
module attributes {stable_mosaic.version = 11 : i64} {
  func.func @_node_prologue_kernel(%arg0: i32, %arg1: memref<384x128xf32, #tpu.memory_space<vmem>>, %arg2: memref<384x1xf32, #tpu.memory_space<vmem>>, %arg3: memref<128x128xf32, #tpu.memory_space<vmem>>, %arg4: memref<1x128xf32, #tpu.memory_space<vmem>>, %arg5: memref<256x256xf32, #tpu.memory_space<vmem>>, %arg6: memref<1x128xf32, #tpu.memory_space<vmem>>, %arg7: memref<384x128xbf16, #tpu.memory_space<vmem>>, %arg8: memref<384x128xf32, #tpu.memory_space<vmem>>) attributes {dimension_semantics = [#tpu.dimension_semantics<parallel>], iteration_bounds = array<i64: 1>, scalar_prefetch = 0 : i64, scratch_operands = 0 : i64, tpu.core_type = #tpu.core_type<tc>, window_params = [{transform_indices = @transform_0, window_bounds = array<i64: 384, 128>}, {transform_indices = @transform_1, window_bounds = array<i64: 384, 1>}, {pipeline_mode = #tpu.pipeline_mode<synchronous>, transform_indices = @transform_2, window_bounds = array<i64: 128, 128>}, {pipeline_mode = #tpu.pipeline_mode<synchronous>, transform_indices = @transform_3, window_bounds = array<i64: 1, 128>}, {pipeline_mode = #tpu.pipeline_mode<synchronous>, transform_indices = @transform_4, window_bounds = array<i64: 256, 256>}, {pipeline_mode = #tpu.pipeline_mode<synchronous>, transform_indices = @transform_5, window_bounds = array<i64: 1, 128>}, {transform_indices = @transform_6, window_bounds = array<i64: 384, 128>}, {transform_indices = @transform_7, window_bounds = array<i64: 384, 128>}]} {
    %c0 = arith.constant 0 : index
    %c0_0 = arith.constant 0 : index
    %0 = vector.load %arg1[%c0, %c0_0] : memref<384x128xf32, #tpu.memory_space<vmem>>, vector<384x128xf32>
    %c0_1 = arith.constant 0 : index
    %c0_2 = arith.constant 0 : index
    %1 = vector.load %arg3[%c0_1, %c0_2] : memref<128x128xf32, #tpu.memory_space<vmem>>, vector<128x128xf32>
    %cst = arith.constant dense<0.000000e+00> : vector<384x128xf32>
    %2 = tpu.matmul %0, %1, %cst {dimension_numbers = #tpu.dot_dimension_numbers<[1], [0], [0], [1], [0, 0, 1, 1], [], []>} : vector<384x128xf32>, vector<128x128xf32>, vector<384x128xf32> -> vector<384x128xf32>
    %c0_3 = arith.constant 0 : index
    %c0_4 = arith.constant 0 : index
    %3 = vector.load %arg4[%c0_3, %c0_4] : memref<1x128xf32, #tpu.memory_space<vmem>>, vector<1x128xf32>
    %4 = vector.broadcast %3 : vector<1x128xf32> to vector<384x128xf32>
    %5 = arith.addf %2, %4 : vector<384x128xf32>
    %c0_5 = arith.constant 0 : index
    %c0_6 = arith.constant 0 : index
    %6 = vector.load %arg2[%c0_5, %c0_6] : memref<384x1xf32, #tpu.memory_space<vmem>>, vector<384x1xf32>
    %7 = vector.broadcast %6 : vector<384x1xf32> to vector<384x128xf32>
    %8 = arith.mulf %7, %5 : vector<384x128xf32>
    %9 = tpu.concatenate %5, %8 in 1 : vector<384x128xf32>, vector<384x128xf32> -> vector<384x256xf32>
    %c0_7 = arith.constant 0 : index
    %c0_8 = arith.constant 0 : index
    %10 = vector.load %arg5[%c0_7, %c0_8] : memref<256x256xf32, #tpu.memory_space<vmem>>, vector<256x256xf32>
    %cst_9 = arith.constant dense<0.000000e+00> : vector<384x256xf32>
    %11 = tpu.matmul %9, %10, %cst_9 {dimension_numbers = #tpu.dot_dimension_numbers<[1], [0], [0], [1], [0, 0, 1, 1], [], []>} : vector<384x256xf32>, vector<256x256xf32>, vector<384x256xf32> -> vector<384x256xf32>
    %12 = vector.extract_strided_slice %11 {offsets = [0, 0], sizes = [384, 128], strides = [1, 1]} : vector<384x256xf32> to vector<384x128xf32>
    %c0_10 = arith.constant 0 : index
    %c0_11 = arith.constant 0 : index
    %13 = vector.load %arg6[%c0_10, %c0_11] : memref<1x128xf32, #tpu.memory_space<vmem>>, vector<1x128xf32>
    %14 = vector.broadcast %13 : vector<1x128xf32> to vector<384x128xf32>
    %15 = arith.addf %12, %14 : vector<384x128xf32>
    %c0_12 = arith.constant 0 : index
    %c0_13 = arith.constant 0 : index
    %16 = vector.load %arg8[%c0_12, %c0_13] : memref<384x128xf32, #tpu.memory_space<vmem>>, vector<384x128xf32>
    tpu.vector_store %arg8[%c0_12, %c0_13], %15 {strides = array<i32>} : memref<384x128xf32, #tpu.memory_space<vmem>>, vector<384x128xf32>,
    %17 = vector.extract_strided_slice %11 {offsets = [0, 128], sizes = [384, 128], strides = [1, 1]} : vector<384x256xf32> to vector<384x128xf32>
    %18 = arith.truncf %17 : vector<384x128xf32> to vector<384x128xbf16>
    %c0_14 = arith.constant 0 : index
    %c0_15 = arith.constant 0 : index
    %19 = vector.load %arg7[%c0_14, %c0_15] : memref<384x128xbf16, #tpu.memory_space<vmem>>, vector<384x128xbf16>
    tpu.vector_store %arg7[%c0_14, %c0_15], %18 {strides = array<i32>} : memref<384x128xbf16, #tpu.memory_space<vmem>>, vector<384x128xbf16>,
    return
  }
  func.func @transform_0(%arg0: i32) -> (i32, i32) {
    %c0_i32 = arith.constant 0 : i32
    %c0_i32_0 = arith.constant 0 : i32
    return %arg0, %c0_i32 : i32, i32
  }
  func.func @transform_1(%arg0: i32) -> (i32, i32) {
    %c0_i32 = arith.constant 0 : i32
    %c0_i32_0 = arith.constant 0 : i32
    return %arg0, %c0_i32 : i32, i32
  }
  func.func @transform_2(%arg0: i32) -> (i32, i32) {
    %c0_i32 = arith.constant 0 : i32
    %c0_i32_0 = arith.constant 0 : i32
    %c0_i32_1 = arith.constant 0 : i32
    return %c0_i32, %c0_i32_0 : i32, i32
  }
  func.func @transform_3(%arg0: i32) -> (i32, i32) {
    %c0_i32 = arith.constant 0 : i32
    %c0_i32_0 = arith.constant 0 : i32
    %c0_i32_1 = arith.constant 0 : i32
    return %c0_i32, %c0_i32_0 : i32, i32
  }
  func.func @transform_4(%arg0: i32) -> (i32, i32) {
    %c0_i32 = arith.constant 0 : i32
    %c0_i32_0 = arith.constant 0 : i32
    %c0_i32_1 = arith.constant 0 : i32
    return %c0_i32, %c0_i32_0 : i32, i32
  }
  func.func @transform_5(%arg0: i32) -> (i32, i32) {
    %c0_i32 = arith.constant 0 : i32
    %c0_i32_0 = arith.constant 0 : i32
    %c0_i32_1 = arith.constant 0 : i32
    return %c0_i32, %c0_i32_0 : i32, i32
  }
  func.func @transform_6(%arg0: i32) -> (i32, i32) {
    %c0_i32 = arith.constant 0 : i32
    %c0_i32_0 = arith.constant 0 : i32
    return %arg0, %c0_i32 : i32, i32
  }
  func.func @transform_7(%arg0: i32) -> (i32, i32) {
    %c0_i32 = arith.constant 0 : i32
    %c0_i32_0 = arith.constant 0 : i32
    return %arg0, %c0_i32 : i32, i32
  }
}

</mosaic_0001>

<bundles_post_ra>
// kernel: tpu_custom_call.1
= control target key start
LH: loop header
LB: loop body
LE: loop exit
PB: predicated region body
PF: predicated region fallthrough
CT: control target
= control target key end

     0   :  { %13 = vsyncpa [#allocation3], 0  ;;  %s2460_s0 = inlined_call_operand.vmem [shape: f32[384,128], index: 0, kind: input, shape index: {}]   ;;  %s2461_s1 = inlined_call_operand.vmem [shape: f32[384,1], index: 1, kind: input, shape index: {}]   ;;  %s2462_s2 = inlined_call_operand.hbm [shape: f32[128,128], index: 2, kind: input, shape index: {}]   ;;  %s2463_s3 = inlined_call_operand.vmem [shape: f32[1,128], index: 3, kind: input, shape index: {}]   ;;  %s2464_s4 = inlined_call_operand.hbm [shape: f32[256,256], index: 4, kind: input, shape index: {}]   ;;  %s2465_s5 = inlined_call_operand.vmem [shape: f32[1,128], index: 5, kind: input, shape index: {}]   ;;  %s2466_s6 = inlined_call_operand.hbm [shape: bf16[384,128], index: 6, kind: output, shape index: {0}]   ;;  %s2467_s7 = inlined_call_operand.hbm [shape: f32[384,128], index: 7, kind: output, shape index: {1}]  }
   0x1   :  { %14 = vsyncpa [#allocation6], 0 }
   0x2   :  { %15 = vsyncpa [#allocation4], 0 }
   0x3   :  { %16 = vsyncpa [#allocation9], 0  ;;  %s25_s26 = sshll.u32 %s2462_s2, 4  ;;  %s1879_s27 = smov [#allocation2]   ;;  %s26_s26 = int_to_ptr.hbm [resolvable:$true] %s25_s26 }
   0x4   :  { %s27_s28 = sshll.u32 %s1879_s27, 4  ;;  %s40_s8 = sshll.u32 %s2464_s4, 4  ;;  %s28_s28 = int_to_ptr.vmem [resolvable:$true] %s27_s28  ;;  %s41_s8 = int_to_ptr.hbm [resolvable:$true] %s40_s8 }
   0x5   :  { %s1880_s9 = smov 128   ;;  %s1881_s10 = smov 8  }
   0x6   :  { %33 = dma.hbm_to_vmem [thread:$0]  %s26_s26, 2048, %s28_s28, [#allocation3], %s1880_s9, %s1880_s9, %s1881_s10  }
   0x7   :  { %s1882_s11 = smov [#allocation5]   ;;  %s1883_s13 = smov 256  }
   0x8   :  { %s42_s12 = sshll.u32 %s1882_s11, 4  ;;  %s1884_s2 = smov 16   ;;  %s43_s12 = int_to_ptr.vmem [resolvable:$true] %s42_s12 }
   0x9   :  { %48 = dma.hbm_to_vmem [thread:$0]  %s41_s8, 8192, %s43_s12, [#allocation6], %s1883_s13, %s1883_s13, %s1884_s2  }
   0xa   :  { %1871 = dma.done.wait [#allocation3], 2048  }
   0xb   :  { %1872 = vsyncadd [#allocation3], 4294965248 }
   0xc   :  { %1873 = dma.done.wait [#allocation6], 8192  }
   0xd   :  { %1874 = vsyncadd [#allocation6], 4294959104  ;;  %v1885_v0 = vmov 0   ;;  %v292_v1 = vld [vmem:[%s2461_s1 + $0x20] sm:$0xff]  ;;  %v290_v2 = vld [vmem:[%s2461_s1 + $0x10] sm:$0xff]  ;;  %s1534_s29 = sshll.u32 %s2466_s6, 4  ;;  %s1535_s29 = int_to_ptr.hbm [resolvable:$true] %s1534_s29 }
   0xe   :  { %1770 = vset.pattern.permute.xlu2 %v1885_v0  ;;  %1769 = vset.pattern.permute.xlu1 %v1885_v0  ;;  %v288_v3 = vld [vmem:[%s2461_s1] sm:$0xff]  ;;  %v122_v4 = vld [vmem:[#allocation2 + $0x78] sm:$0xff]  ;;  %v121_v5 = vld [vmem:[#allocation2 + $0x70] sm:$0xff]  ;;  %s1887_s30 = smov [#allocation8]   ;;  %s1547_s13 = sshll.u32 %s2467_s7, 4  ;;  %s1548_s13 = int_to_ptr.hbm [resolvable:$true] %s1547_s13 }
   0xf   :  { %1768 = vset.pattern.permute.xlu0 %v1885_v0  ;;  %358 = vperm.xlu2 %1770, %v292_v1   ;;  %v120_v6 = vld [vmem:[#allocation2 + $0x68] sm:$0xff]  ;;  %v119_v7 = vld [vmem:[#allocation2 + $0x60] sm:$0xff]  ;;  %v291_v9 = vld [vmem:[%s2461_s1 + $0x18] sm:$0xff]  ;;  %s1545_s8 = sshll.u32 %s1887_s30, 4  ;;  %s1888_s6 = smov 64   ;;  %s1546_s8 = int_to_ptr.vmem [resolvable:$true] %s1545_s8 }
  0x10   :  { %348 = vperm.xlu1 %1769, %v290_v2   ;;  %338 = vperm.xlu0 %1768, %v288_v3   ;;  %v293_v8 = vld [vmem:[%s2461_s1 + $0x28] sm:$0xff]  ;;  %v118_v11 = vld [vmem:[#allocation2 + $0x58] sm:$0xff]  ;;  %v117_v12 = vld [vmem:[#allocation2 + $0x50] sm:$0xff]  ;;  %s1889_s2 = smov 4  }
  0x11   :  { %127 = vmatpush.msra.mxu0 %v122_v4  ;;  %1709 = vmatpush.msra.mxu1 %v122_v4  ;;  %v289_v10 = vld [vmem:[%s2461_s1 + $0x8] sm:$0xff]  ;;  %v115_v14 = vld [vmem:[#allocation2 + $0x40] sm:$0xff]  ;;  %v295_v16 = vld [vmem:[%s2461_s1 + $0x38] sm:$0xff] }
  0x12   :  { %1710 = vmatpush.msra.mxu2 %v122_v4  ;;  %1711 = vmatpush.msra.mxu3 %v122_v4  ;;  %v116_v13 = vld [vmem:[#allocation2 + $0x48] sm:$0xff]  ;;  %v296_v15 = vld [vmem:[%s2461_s1 + $0x40] sm:$0xff]  ;;  %v294_v17 = vld [vmem:[%s2461_s1 + $0x30] sm:$0xff] }
  0x13   :  { %128 = vmatpush.msra.mxu0 %v121_v5  ;;  %1712 = vmatpush.msra.mxu1 %v121_v5  ;;  %v114_v18 = vld [vmem:[#allocation2 + $0x38] sm:$0xff]  ;;  %v113_v19 = vld [vmem:[#allocation2 + $0x30] sm:$0xff]  ;;  %v112_v20 = vld [vmem:[#allocation2 + $0x28] sm:$0xff] }
  0x14   :  { %1713 = vmatpush.msra.mxu2 %v121_v5  ;;  %1714 = vmatpush.msra.mxu3 %v121_v5  ;;  %v111_v21 = vld [vmem:[#allocation2 + $0x20] sm:$0xff]  ;;  %v299_v22 = vld [vmem:[%s2461_s1 + $0x58] sm:$0xff]  ;;  %v298_v23 = vld [vmem:[%s2461_s1 + $0x50] sm:$0xff] }
  0x15   :  { %129 = vmatpush.msra.mxu0 %v120_v6  ;;  %1715 = vmatpush.msra.mxu1 %v120_v6  ;;  %v297_v24 = vld [vmem:[%s2461_s1 + $0x48] sm:$0xff]  ;;  %v110_v25 = vld [vmem:[#allocation2 + $0x18] sm:$0xff]  ;;  %v109_v26 = vld [vmem:[#allocation2 + $0x10] sm:$0xff] }
  0x16   :  { %1716 = vmatpush.msra.mxu2 %v120_v6  ;;  %1717 = vmatpush.msra.mxu3 %v120_v6  ;;  %v108_v27 = vld [vmem:[#allocation2 + $0x8] sm:$0xff]  ;;  %v107_v28 = vld [vmem:[#allocation2] sm:$0xff]  ;;  %v302_v33 = vld [vmem:[%s2461_s1 + $0x70] sm:$0xff] }
  0x17   :  { %130 = vmatpush.msra.mxu0 %v119_v7  ;;  %1718 = vmatpush.msra.mxu1 %v119_v7  ;;  %v59_v29 = vld [vmem:[%s2460_s0] sm:$0xff]  ;;  %v301_v34 = vld [vmem:[%s2461_s1 + $0x68] sm:$0xff]  ;;  %v686_v36 = vld [vmem:[#allocation5 + $0x1f0] sm:$0xff] }
  0x18   :  { %1719 = vmatpush.msra.mxu2 %v119_v7  ;;  %1720 = vmatpush.msra.mxu3 %v119_v7  ;;  %v71_v30 = vld [vmem:[%s2460_s0 + $0x60] sm:$0xff]  ;;  %v655_v37 = vld [vmem:[#allocation5 + $0xf8] sm:$0xff]  ;;  %v60_v38 = vld [vmem:[%s2460_s0 + $0x8] sm:$0xff] }
  0x19   :  { %363 = vperm.xlu2 %1770, %v293_v8   ;;  %353 = vperm.xlu1 %1769, %v291_v9   ;;  %v83_v31 = vld [vmem:[%s2460_s0 + $0xc0] sm:$0xff]  ;;  %v72_v39 = vld [vmem:[%s2460_s0 + $0x68] sm:$0xff]  ;;  %v303_v44 = vld [vmem:[%s2461_s1 + $0x78] sm:$0xff] }
  0x1a   :  { %343 = vperm.xlu0 %1768, %v289_v10   ;;  %131 = vmatpush.msra.mxu0 %v118_v11  ;;  %v95_v32 = vld [vmem:[%s2460_s0 + $0x120] sm:$0xff]  ;;  %v84_v40 = vld [vmem:[%s2460_s0 + $0xc8] sm:$0xff]  ;;  %v654_v45 = vld [vmem:[#allocation5 + $0xf0] sm:$0xff] }
  0x1b   :  { %1721 = vmatpush.msra.mxu1 %v118_v11  ;;  %1722 = vmatpush.msra.mxu2 %v118_v11  ;;  %v300_v35 = vld [vmem:[%s2461_s1 + $0x60] sm:$0xff]  ;;  %v96_v41 = vld [vmem:[%s2460_s0 + $0x128] sm:$0xff]  ;;  %v687_v48 = vld [vmem:[#allocation5 + $0x1f8] sm:$0xff] }
  0x1c   :  { %1723 = vmatpush.msra.mxu3 %v118_v11  ;;  %132 = vmatpush.msra.mxu0 %v117_v12  ;;  %v305_v42 = vld [vmem:[%s2461_s1 + $0x88] sm:$0xff]  ;;  %v304_v43 = vld [vmem:[%s2461_s1 + $0x80] sm:$0xff]  ;;  %v682_v50 = vld [vmem:[#allocation5 + $0x1d0] sm:$0xff] }
  0x1d   :  { %1724 = vmatpush.msra.mxu1 %v117_v12  ;;  %1725 = vmatpush.msra.mxu2 %v117_v12  ;;  %v684_v46 = vld [vmem:[#allocation5 + $0x1e0] sm:$0xff]  ;;  %v653_v47 = vld [vmem:[#allocation5 + $0xe8] sm:$0xff]  ;;  %v651_v51 = vld [vmem:[#allocation5 + $0xd8] sm:$0xff] }
  0x1e   :  { %1726 = vmatpush.msra.mxu3 %v117_v12  ;;  %133 = vmatpush.msra.mxu0 %v116_v13  ;;  %v652_v49 = vld [vmem:[#allocation5 + $0xe0] sm:$0xff]  ;;  %v685_v52 = vld [vmem:[#allocation5 + $0x1e8] sm:$0xff]  ;;  %v61_v53 = vld [vmem:[%s2460_s0 + $0x10] sm:$0xff] }
  0x1f   :  { %1727 = vmatpush.msra.mxu1 %v116_v13  ;;  %1728 = vmatpush.msra.mxu2 %v116_v13  ;;  %v73_v54 = vld [vmem:[%s2460_s0 + $0x70] sm:$0xff]  ;;  %v308_v57 = vld [vmem:[%s2461_s1 + $0xa0] sm:$0xff]  ;;  %v307_v58 = vld [vmem:[%s2461_s1 + $0x98] sm:$0xff] }
  0x20   :  { %1729 = vmatpush.msra.mxu3 %v116_v13  ;;  %134 = vmatpush.msra.mxu0 %v115_v14  ;;  %v85_v55 = vld [vmem:[%s2460_s0 + $0xd0] sm:$0xff]  ;;  %v680_v61 = vld [vmem:[#allocation5 + $0x1c0] sm:$0xff]  ;;  %v649_v62 = vld [vmem:[#allocation5 + $0xc8] sm:$0xff] }
  0x21   :  { %1730 = vmatpush.msra.mxu1 %v115_v14  ;;  %1731 = vmatpush.msra.mxu2 %v115_v14  ;;  %v97_v56 = vld [vmem:[%s2460_s0 + $0x130] sm:$0xff]  ;;  %v683_v63 = vld [vmem:[#allocation5 + $0x1d8] sm:$0xff]  ;;  %v309_v6 = vld [vmem:[%s2461_s1 + $0xa8] sm:$0xff] }
  0x22   :  { %1732 = vmatpush.msra.mxu3 %v115_v14  ;;  %378 = vperm.xlu2 %1770, %v296_v15   ;;  %v306_v59 = vld [vmem:[%s2461_s1 + $0x90] sm:$0xff]  ;;  %v62_v0 = vld [vmem:[%s2460_s0 + $0x18] sm:$0xff]  ;;  %v648_v7 = vld [vmem:[#allocation5 + $0xc0] sm:$0xff] }
  0x23   :  { %373 = vperm.xlu1 %1769, %v295_v16   ;;  %368 = vperm.xlu0 %1768, %v294_v17   ;;  %v650_v60 = vld [vmem:[#allocation5 + $0xd0] sm:$0xff]  ;;  %v74_v1 = vld [vmem:[%s2460_s0 + $0x78] sm:$0xff]  ;;  %v681_v10 = vld [vmem:[#allocation5 + $0x1c8] sm:$0xff] }
  0x24   :  { %135 = vmatpush.msra.mxu0 %v114_v18  ;;  %1733 = vmatpush.msra.mxu1 %v114_v18  ;;  %v86_v2 = vld [vmem:[%s2460_s0 + $0xd8] sm:$0xff]  ;;  %v310_v5 = vld [vmem:[%s2461_s1 + $0xb0] sm:$0xff]  ;;  %v63_v11 = vld [vmem:[%s2460_s0 + $0x20] sm:$0xff] }
  0x25   :  { %1734 = vmatpush.msra.mxu2 %v114_v18  ;;  %1735 = vmatpush.msra.mxu3 %v114_v18  ;;  %v98_v3 = vld [vmem:[%s2460_s0 + $0x138] sm:$0xff]  ;;  %v678_v8 = vld [vmem:[#allocation5 + $0x1b0] sm:$0xff]  ;;  %v75_v12 = vld [vmem:[%s2460_s0 + $0x80] sm:$0xff] }
  0x26   :  { %136 = vmatpush.msra.mxu0 %v113_v19  ;;  %1736 = vmatpush.msra.mxu1 %v113_v19  ;;  %v311_v4 = vld [vmem:[%s2461_s1 + $0xb8] sm:$0xff]  ;;  %v87_v13 = vld [vmem:[%s2460_s0 + $0xe0] sm:$0xff]  ;;  %v314_v15 = vld [vmem:[%s2461_s1 + $0xd0] sm:$0xff] }
  0x27   :  { %1737 = vmatpush.msra.mxu2 %v113_v19  ;;  %1738 = vmatpush.msra.mxu3 %v113_v19  ;;  %v647_v9 = vld [vmem:[#allocation5 + $0xb8] sm:$0xff]  ;;  %v99_v14 = vld [vmem:[%s2460_s0 + $0x140] sm:$0xff]  ;;  %v313_v16 = vld [vmem:[%s2461_s1 + $0xc8] sm:$0xff] }
  0x28   :  { %137 = vmatpush.msra.mxu0 %v112_v20  ;;  %1739 = vmatpush.msra.mxu1 %v112_v20  ;;  %v312_v17 = vld [vmem:[%s2461_s1 + $0xc0] sm:$0xff]  ;;  %v646_v18 = vld [vmem:[#allocation5 + $0xb0] sm:$0xff] }
  0x29   :  { %1740 = vmatpush.msra.mxu2 %v112_v20  ;;  %1741 = vmatpush.msra.mxu3 %v112_v20  ;;  %v676_v19 = vld [vmem:[#allocation5 + $0x1a0] sm:$0xff]  ;;  %v645_v20 = vld [vmem:[#allocation5 + $0xa8] sm:$0xff] }
  0x2a   :  { %138 = vmatpush.msra.mxu0 %v111_v21  ;;  %1742 = vmatpush.msra.mxu1 %v111_v21 }
  0x2b   :  { %1743 = vmatpush.msra.mxu2 %v111_v21  ;;  %1744 = vmatpush.msra.mxu3 %v111_v21  ;;  %v679_v21 = vld [vmem:[#allocation5 + $0x1b8] sm:$0xff] }
  0x2c   :  { %393 = vperm.xlu2 %1770, %v299_v22   ;;  %388 = vperm.xlu1 %1769, %v298_v23   ;;  %v644_v22 = vld [vmem:[#allocation5 + $0xa0] sm:$0xff]  ;;  %v674_v23 = vld [vmem:[#allocation5 + $0x190] sm:$0xff] }
  0x2d   :  { %383 = vperm.xlu0 %1768, %v297_v24   ;;  %139 = vmatpush.msra.mxu0 %v110_v25  ;;  %v643_v24 = vld [vmem:[#allocation5 + $0x98] sm:$0xff] }
  0x2e   :  { %1745 = vmatpush.msra.mxu1 %v110_v25  ;;  %1746 = vmatpush.msra.mxu2 %v110_v25 }
  0x2f   :  { %1747 = vmatpush.msra.mxu3 %v110_v25  ;;  %140 = vmatpush.msra.mxu0 %v109_v26  ;;  %v677_v25 = vld [vmem:[#allocation5 + $0x1a8] sm:$0xff] }
  0x30   :  { %1748 = vmatpush.msra.mxu1 %v109_v26  ;;  %1749 = vmatpush.msra.mxu2 %v109_v26 }
  0x31   :  { %1750 = vmatpush.msra.mxu3 %v109_v26  ;;  %141 = vmatpush.msra.mxu0 %v108_v27  ;;  %v64_v26 = vld [vmem:[%s2460_s0 + $0x28] sm:$0xff] }
  0x32   :  { %1751 = vmatpush.msra.mxu1 %v108_v27  ;;  %1752 = vmatpush.msra.mxu2 %v108_v27 }
  0x33   :  { %1753 = vmatpush.msra.mxu3 %v108_v27  ;;  %142 = vmatpush.msra.mxu0 %v107_v28  ;;  %v76_v27 = vld [vmem:[%s2460_s0 + $0x88] sm:$0xff] }
  0x34   :  { %1754 = vmatpush.msra.mxu1 %v107_v28  ;;  %1755 = vmatpush.msra.mxu2 %v107_v28 }
  0x35   :  { %1756 = vmatpush.msra.mxu3 %v107_v28  ;;  %143 = vmatmul.f32.vlgmr.msra.gmra.mxu0 %v59_v29  ;;  %v88_v28 = vld [vmem:[%s2460_s0 + $0xe8] sm:$0xff] }
  0x36   :  { %179 = vmatmul.f32.vlgmr.msra.gmra.mxu1 %v71_v30  ;;  %215 = vmatmul.f32.vlgmr.msra.gmra.mxu2 %v83_v31  ;;  %v100_v29 = vld [vmem:[%s2460_s0 + $0x148] sm:$0xff]  ;;  %v316_v31 = vld [vmem:[%s2461_s1 + $0xe0] sm:$0xff] }
  0x37   :  { %251 = vmatmul.f32.vlgmr.msra.gmra.mxu3 %v95_v32  ;;  %408 = vperm.xlu2 %1770, %v302_v33   ;;  %v317_v30 = vld [vmem:[%s2461_s1 + $0xe8] sm:$0xff]  ;;  %v315_v32 = vld [vmem:[%s2461_s1 + $0xd8] sm:$0xff]  ;;  %v642_v33 = vld [vmem:[#allocation5 + $0x90] sm:$0xff] }
  0x38   :  { %403 = vperm.xlu1 %1769, %v301_v34   ;;  %398 = vperm.xlu0 %1768, %v300_v35   ;;  %v672_v34 = vld [vmem:[#allocation5 + $0x180] sm:$0xff]  ;;  %v641_v35 = vld [vmem:[#allocation5 + $0x88] sm:$0xff] }
  0x39   :  { %849 = vmatpush.msrb.mxu2 %v686_v36  ;;  %1010 = vmatpush.msrb.mxu3 %v655_v37  ;;  %v675_v36 = vld [vmem:[#allocation5 + $0x198] sm:$0xff]  ;;  %v65_v37 = vld [vmem:[%s2460_s0 + $0x30] sm:$0xff] }
  0x3a   :  { %688 = vmatpush.msrb.mxu1 %v654_v45  ;;  %1171 = vmatpush.msrb.mxu0 %v687_v48  ;;  %v670_v45 = vld [vmem:[#allocation5 + $0x170] sm:$0xff]  ;;  %v66_v48 = vld [vmem:[%s2460_s0 + $0x38] sm:$0xff] }
  0x3b   :  { %850 = vmatpush.msrb.mxu2 %v684_v46  ;;  %1011 = vmatpush.msrb.mxu3 %v653_v47  ;;  %v639_v46 = vld [vmem:[#allocation5 + $0x78] sm:$0xff]  ;;  %v673_v47 = vld [vmem:[#allocation5 + $0x188] sm:$0xff] }
  0x3c   :  { %689 = vmatpush.msrb.mxu1 %v652_v49  ;;  %1172 = vmatpush.msrb.mxu0 %v685_v52  ;;  %v78_v49 = vld [vmem:[%s2460_s0 + $0x98] sm:$0xff] }
  0x3d   :  { %146 = vmatmul.f32.gmra.mxu0 %v60_v38  ;;  %851 = vmatpush.msrb.mxu2 %v682_v50  ;;  %v77_v38 = vld [vmem:[%s2460_s0 + $0x90] sm:$0xff]  ;;  %v90_v50 = vld [vmem:[%s2460_s0 + $0xf8] sm:$0xff] }
  0x3e   :  { %182 = vmatmul.f32.gmra.mxu1 %v72_v39  ;;  %218 = vmatmul.f32.gmra.mxu2 %v84_v40  ;;  %v89_v39 = vld [vmem:[%s2460_s0 + $0xf0] sm:$0xff]  ;;  %v323_v52 = vld [vmem:[%s2461_s1 + $0x118] sm:$0xff] }
  0x3f   :  { %254 = vmatmul.f32.gmra.mxu3 %v96_v41  ;;  %423 = vperm.xlu2 %1770, %v305_v42   ;;  %v101_v40 = vld [vmem:[%s2460_s0 + $0x150] sm:$0xff]  ;;  %v320_v41 = vld [vmem:[%s2461_s1 + $0x100] sm:$0xff]  ;;  %v319_v42 = vld [vmem:[%s2461_s1 + $0xf8] sm:$0xff] }
  0x40   :  { %418 = vperm.xlu1 %1769, %v304_v43   ;;  %413 = vperm.xlu0 %1768, %v303_v44   ;;  %v318_v43 = vld [vmem:[%s2461_s1 + $0xf0] sm:$0xff]  ;;  %v640_v44 = vld [vmem:[#allocation5 + $0x80] sm:$0xff] }
  0x41   :  { %1012 = vmatpush.msrb.mxu3 %v651_v51  ;;  %690 = vmatpush.msrb.mxu1 %v650_v60  ;;  %v102_v51 = vld [vmem:[%s2460_s0 + $0x158] sm:$0xff]  ;;  %v666_v60 = vld [vmem:[#allocation5 + $0x150] sm:$0xff] }
  0x42   :  { %852 = vmatpush.msrb.mxu2 %v680_v61  ;;  %1173 = vmatpush.msrb.mxu0 %v683_v63  ;;  %v635_v61 = vld [vmem:[#allocation5 + $0x58] sm:$0xff]  ;;  %v79_v63 = vld [vmem:[%s2460_s0 + $0xa0] sm:$0xff] }
  0x43   :  { %1013 = vmatpush.msrb.mxu3 %v649_v62  ;;  %691 = vmatpush.msrb.mxu1 %v648_v7  ;;  %v67_v62 = vld [vmem:[%s2460_s0 + $0x40] sm:$0xff]  ;;  %v80_v7 = vld [vmem:[%s2460_s0 + $0xa8] sm:$0xff] }
  0x44   :  { %853 = vmatpush.msrb.mxu2 %v678_v8  ;;  %1174 = vmatpush.msrb.mxu0 %v681_v10  ;;  %v634_v8 = vld [vmem:[#allocation5 + $0x50] sm:$0xff]  ;;  %v633_v10 = vld [vmem:[#allocation5 + $0x48] sm:$0xff] }
  0x45   :  { %149 = vmatmul.f32.gmra.mxu0 %v61_v53  ;;  %1014 = vmatpush.msrb.mxu3 %v647_v9  ;;  %v322_v53 = vld [vmem:[%s2461_s1 + $0x110] sm:$0xff]  ;;  %v664_v9 = vld [vmem:[#allocation5 + $0x140] sm:$0xff] }
  0x46   :  { %185 = vmatmul.f32.gmra.mxu1 %v73_v54  ;;  %221 = vmatmul.f32.gmra.mxu2 %v85_v55  ;;  %v321_v54 = vld [vmem:[%s2461_s1 + $0x108] sm:$0xff]  ;;  %v638_v55 = vld [vmem:[#allocation5 + $0x70] sm:$0xff] }
  0x47   :  { %257 = vmatmul.f32.gmra.mxu3 %v97_v56  ;;  %438 = vperm.xlu2 %1770, %v308_v57   ;;  %v668_v56 = vld [vmem:[#allocation5 + $0x160] sm:$0xff]  ;;  %v637_v57 = vld [vmem:[#allocation5 + $0x68] sm:$0xff] }
  0x48   :  { %433 = vperm.xlu1 %1769, %v307_v58   ;;  %428 = vperm.xlu0 %1768, %v306_v59   ;;  %v671_v58 = vld [vmem:[#allocation5 + $0x178] sm:$0xff]  ;;  %v636_v59 = vld [vmem:[#allocation5 + $0x60] sm:$0xff] }
  0x49   :  { %692 = vmatpush.msrb.mxu1 %v646_v18  ;;  %854 = vmatpush.msrb.mxu2 %v676_v19  ;;  %v327_v18 = vld [vmem:[%s2461_s1 + $0x138] sm:$0xff] }
  0x4a   :  { %1015 = vmatpush.msrb.mxu3 %v645_v20  ;;  %1175 = vmatpush.msrb.mxu0 %v679_v21  ;;  %v631_v19 = vld [vmem:[#allocation5 + $0x38] sm:$0xff]  ;;  %v665_v20 = vld [vmem:[#allocation5 + $0x148] sm:$0xff]  ;;  %v630_v21 = vld [vmem:[#allocation5 + $0x30] sm:$0xff] }
  0x4b   :  { %693 = vmatpush.msrb.mxu1 %v644_v22  ;;  %855 = vmatpush.msrb.mxu2 %v674_v23  ;;  %v660_v22 = vld [vmem:[#allocation5 + $0x120] sm:$0xff]  ;;  %v629_v23 = vld [vmem:[#allocation5 + $0x28] sm:$0xff] }
  0x4c   :  { %1016 = vmatpush.msrb.mxu3 %v643_v24  ;;  %1176 = vmatpush.msrb.mxu0 %v677_v25  ;;  %v69_v24 = vld [vmem:[%s2460_s0 + $0x50] sm:$0xff] }
  0x4d   :  { %152 = vmatmul.f32.gmra.mxu0 %v62_v0  ;;  %694 = vmatpush.msrb.mxu1 %v642_v33  ;;  %v669_v0 = vld [vmem:[#allocation5 + $0x168] sm:$0xff]  ;;  %v81_v25 = vld [vmem:[%s2460_s0 + $0xb0] sm:$0xff]  ;;  %v82_v33 = vld [vmem:[%s2460_s0 + $0xb8] sm:$0xff] }
  0x4e   :  { %188 = vmatmul.f32.gmra.mxu1 %v74_v1  ;;  %224 = vmatmul.f32.gmra.mxu2 %v86_v2  ;;  %v91_v1 = vld [vmem:[%s2460_s0 + $0x100] sm:$0xff] }
  0x4f   :  { %260 = vmatmul.f32.gmra.mxu3 %v98_v3  ;;  %453 = vperm.xlu2 %1770, %v311_v4   ;;  %v103_v2 = vld [vmem:[%s2460_s0 + $0x160] sm:$0xff]  ;;  %v326_v3 = vld [vmem:[%s2461_s1 + $0x130] sm:$0xff]  ;;  %v325_v4 = vld [vmem:[%s2461_s1 + $0x128] sm:$0xff] }
  0x50   :  { %448 = vperm.xlu1 %1769, %v310_v5   ;;  %443 = vperm.xlu0 %1768, %v309_v6   ;;  %v324_v5 = vld [vmem:[%s2461_s1 + $0x120] sm:$0xff]  ;;  %v68_v6 = vld [vmem:[%s2460_s0 + $0x48] sm:$0xff] }
  0x51   :  { %856 = vmatpush.msrb.mxu2 %v672_v34  ;;  %1017 = vmatpush.msrb.mxu3 %v641_v35  ;;  %v628_v34 = vld [vmem:[#allocation5 + $0x20] sm:$0xff]  ;;  %v658_v35 = vld [vmem:[#allocation5 + $0x110] sm:$0xff] }
  0x52   :  { %1177 = vmatpush.msrb.mxu0 %v675_v36  ;;  %695 = vmatpush.msrb.mxu1 %v640_v44  ;;  %v627_v36 = vld [vmem:[#allocation5 + $0x18] sm:$0xff]  ;;  %v656_v44 = vld [vmem:[#allocation5 + $0x100] sm:$0xff] }
  0x53   :  { %857 = vmatpush.msrb.mxu2 %v670_v45  ;;  %1018 = vmatpush.msrb.mxu3 %v639_v46  ;;  %v625_v45 = vld [vmem:[#allocation5 + $0x8] sm:$0xff]  ;;  %v659_v46 = vld [vmem:[#allocation5 + $0x118] sm:$0xff] }
  0x54   :  { %1178 = vmatpush.msrb.mxu0 %v673_v47  ;;  %696 = vmatpush.msrb.mxu1 %v638_v55  ;;  %v624_v47 = vld [vmem:[#allocation5] sm:$0xff] }
  0x55   :  { %155 = vmatmul.f32.gmra.mxu0 %v63_v11  ;;  %858 = vmatpush.msrb.mxu2 %v668_v56  ;;  %v667_v11 = vld [vmem:[#allocation5 + $0x158] sm:$0xff] }
  0x56   :  { %191 = vmatmul.f32.gmra.mxu1 %v75_v12  ;;  %227 = vmatmul.f32.gmra.mxu2 %v87_v13  ;;  %v632_v12 = vld [vmem:[#allocation5 + $0x40] sm:$0xff]  ;;  %v662_v13 = vld [vmem:[#allocation5 + $0x130] sm:$0xff] }
  0x57   :  { %263 = vmatmul.f32.gmra.mxu3 %v99_v14  ;;  %468 = vperm.xlu2 %1770, %v314_v15   ;;  %v92_v14 = vld [vmem:[%s2460_s0 + $0x108] sm:$0xff] }
  0x58   :  { %463 = vperm.xlu1 %1769, %v313_v16   ;;  %458 = vperm.xlu0 %1768, %v312_v17   ;;  %v104_v15 = vld [vmem:[%s2460_s0 + $0x168] sm:$0xff]  ;;  %v328_v17 = vld [vmem:[%s2461_s1 + $0x140] sm:$0xff] }
  0x59   :  { %1019 = vmatpush.msrb.mxu3 %v637_v57  ;;  %1179 = vmatpush.msrb.mxu0 %v671_v58  ;;  %v329_v16 = vld [vmem:[%s2461_s1 + $0x148] sm:$0xff] }
  0x5a   :  { %697 = vmatpush.msrb.mxu1 %v636_v59  ;;  %859 = vmatpush.msrb.mxu2 %v666_v60 }
  0x5b   :  { %1020 = vmatpush.msrb.mxu3 %v635_v61  ;;  %1180 = vmatpush.msrb.mxu0 %v669_v0 }
  0x5c   :  { %698 = vmatpush.msrb.mxu1 %v634_v8  ;;  %860 = vmatpush.msrb.mxu2 %v664_v9 }
  0x5d   :  { %158 = vmatmul.f32.gmra.mxu0 %v64_v26  ;;  %1021 = vmatpush.msrb.mxu3 %v633_v10  ;;  %v663_v26 = vld [vmem:[#allocation5 + $0x138] sm:$0xff] }
  0x5e   :  { %194 = vmatmul.f32.gmra.mxu1 %v76_v27  ;;  %230 = vmatmul.f32.gmra.mxu2 %v88_v28  ;;  %v93_v27 = vld [vmem:[%s2460_s0 + $0x110] sm:$0xff] }
  0x5f   :  { %266 = vmatmul.f32.gmra.mxu3 %v100_v29  ;;  %483 = vperm.xlu2 %1770, %v317_v30   ;;  %v105_v28 = vld [vmem:[%s2460_s0 + $0x170] sm:$0xff]  ;;  %v332_v29 = vld [vmem:[%s2461_s1 + $0x160] sm:$0xff]  ;;  %v331_v30 = vld [vmem:[%s2461_s1 + $0x158] sm:$0xff] }
  0x60   :  { %478 = vperm.xlu1 %1769, %v316_v31   ;;  %473 = vperm.xlu0 %1768, %v315_v32   ;;  %v330_v31 = vld [vmem:[%s2461_s1 + $0x150] sm:$0xff]  ;;  %v70_v32 = vld [vmem:[%s2460_s0 + $0x58] sm:$0xff] }
  0x61   :  { %1181 = vmatpush.msrb.mxu0 %v667_v11  ;;  %699 = vmatpush.msrb.mxu1 %v632_v12 }
  0x62   :  { %861 = vmatpush.msrb.mxu2 %v662_v13  ;;  %1022 = vmatpush.msrb.mxu3 %v631_v19 }
  0x63   :  { %1182 = vmatpush.msrb.mxu0 %v665_v20  ;;  %700 = vmatpush.msrb.mxu1 %v630_v21 }
  0x64   :  { %862 = vmatpush.msrb.mxu2 %v660_v22  ;;  %1023 = vmatpush.msrb.mxu3 %v629_v23 }
  0x65   :  { %161 = vmatmul.f32.gmra.mxu0 %v65_v37  ;;  %v94_v37 = vld [vmem:[%s2460_s0 + $0x118] sm:$0xff]  ;;  %701 = vmatpush.msrb.mxu1 %v628_v34 }
  0x66   :  { %197 = vmatmul.f32.gmra.mxu1 %v77_v38  ;;  %233 = vmatmul.f32.gmra.mxu2 %v89_v39  ;;  %v106_v38 = vld [vmem:[%s2460_s0 + $0x178] sm:$0xff]  ;;  %v661_v39 = vld [vmem:[#allocation5 + $0x128] sm:$0xff] }
  0x67   :  { %269 = vmatmul.f32.gmra.mxu3 %v101_v40  ;;  %498 = vperm.xlu2 %1770, %v320_v41   ;;  %v335_v40 = vld [vmem:[%s2461_s1 + $0x178] sm:$0xff]  ;;  %v334_v41 = vld [vmem:[%s2461_s1 + $0x170] sm:$0xff] }
  0x68   :  { %493 = vperm.xlu1 %1769, %v319_v42   ;;  %488 = vperm.xlu0 %1768, %v318_v43   ;;  %v333_v42 = vld [vmem:[%s2461_s1 + $0x168] sm:$0xff]  ;;  %v626_v43 = vld [vmem:[#allocation5 + $0x10] sm:$0xff] }
  0x69   :  { %1183 = vmatpush.msrb.mxu0 %v663_v26  ;;  %863 = vmatpush.msrb.mxu2 %v658_v35  ;;  %v359_v9 = vpop.permute.xlu2 %358 }
  0x6a   :  { %1024 = vmatpush.msrb.mxu3 %v627_v36  ;;  %702 = vmatpush.msrb.mxu1 %v626_v43 }
  0x6b   :  { %1184 = vmatpush.msrb.mxu0 %v661_v39  ;;  %864 = vmatpush.msrb.mxu2 %v656_v44 }
  0x6c   :  { %1025 = vmatpush.msrb.mxu3 %v625_v45  ;;  %703 = vmatpush.msrb.mxu1 %v624_v47 }
  0x6d   :  { %164 = vmatmul.f32.gmra.mxu0 %v66_v48  ;;  %v657_v48 = vld [vmem:[#allocation5 + $0x108] sm:$0xff] }
  0x6e   :  { %200 = vmatmul.f32.gmra.mxu1 %v78_v49  ;;  %236 = vmatmul.f32.gmra.mxu2 %v90_v50  ;;  %v2230_v49 = vld [vmem:[%s2463_s3] ss:$0 sm:$0xff] }
  0x6f   :  { %272 = vmatmul.f32.gmra.mxu3 %v102_v51  ;;  %513 = vperm.xlu2 %1770, %v323_v52  }
  0x70   :  { %508 = vperm.xlu1 %1769, %v322_v53   ;;  %503 = vperm.xlu0 %1768, %v321_v54  }
  0x71   :  { %1185 = vmatpush.msrb.mxu0 %v659_v46 }
  0x73   :  { %1186 = vmatpush.msrb.mxu0 %v657_v48 }
  0x75   :  { %167 = vmatmul.f32.gmra.mxu0 %v67_v62 }
  0x76   :  { %203 = vmatmul.f32.gmra.mxu1 %v79_v63  ;;  %239 = vmatmul.f32.gmra.mxu2 %v91_v1 }
  0x77   :  { %275 = vmatmul.f32.gmra.mxu3 %v103_v2  ;;  %528 = vperm.xlu2 %1770, %v326_v3  }
  0x78   :  { %523 = vperm.xlu1 %1769, %v325_v4   ;;  %518 = vperm.xlu0 %1768, %v324_v5  }
  0x7d   :  { %170 = vmatmul.f32.gmra.mxu0 %v68_v6 }
  0x7e   :  { %206 = vmatmul.f32.gmra.mxu1 %v80_v7  ;;  %242 = vmatmul.f32.gmra.mxu2 %v92_v14 }
  0x7f   :  { %278 = vmatmul.f32.gmra.mxu3 %v104_v15  ;;  %543 = vperm.xlu2 %1770, %v329_v16  }
  0x80   :  { %538 = vperm.xlu1 %1769, %v328_v17   ;;  %533 = vperm.xlu0 %1768, %v327_v18   ;;  %v364_v18 = vpop.permute.xlu2 %363 }
  0x82   :  { %v339_v51 = vpop.permute.xlu0 %338  ;;  %v349_v60 = vpop.permute.xlu1 %348 }
  0x85   :  { %173 = vmatmul.f32.gmra.mxu0 %v69_v24 }
  0x86   :  { %209 = vmatmul.f32.gmra.mxu1 %v81_v25  ;;  %245 = vmatmul.f32.gmra.mxu2 %v93_v27 }
  0x87   :  { %281 = vmatmul.f32.gmra.mxu3 %v105_v28  ;;  %558 = vperm.xlu2 %1770, %v332_v29  }
  0x88   :  { %553 = vperm.xlu1 %1769, %v331_v30   ;;  %548 = vperm.xlu0 %1768, %v330_v31  }
  0x8b   :  { %v354_v5 = vpop.permute.xlu1 %353 }
  0x8c   :  { %v344_v57 = vpop.permute.xlu0 %343 }
  0x8d   :  { %176 = vmatmul.f32.gmra.mxu0 %v70_v32 }
  0x8e   :  { %212 = vmatmul.f32.gmra.mxu1 %v82_v33  ;;  %248 = vmatmul.f32.gmra.mxu2 %v94_v37  ;;  %v379_v37 = vpop.permute.xlu2 %378 }
  0x8f   :  { %284 = vmatmul.f32.gmra.mxu3 %v106_v38  ;;  %573 = vperm.xlu2 %1770, %v335_v40  }
  0x90   :  { %568 = vperm.xlu1 %1769, %v334_v41   ;;  %563 = vperm.xlu0 %1768, %v333_v42  }
  0x95   :  { %v369_v25 = vpop.permute.xlu0 %368  ;;  %v374_v31 = vpop.permute.xlu1 %373 }
  0x9f   :  { %v384_v43 = vpop.permute.xlu0 %383 }
  0xb2   :  { %v144_v50 = vpop.f32.mrf.mxu0 }
  0xb3   :  { %v145_v52 = vadd.f32 %v2230_v49, %v144_v50  ;;  %v2233_v55 = vpop.f32.mrf.mxu1 }
  0xb5   :  { %704 = vmatmul.f32.vlgmr.msrb.gmra.mxu1 %v145_v52  ;;  %1026 = vmatmul.f32.vlgmr.msrb.gmra.mxu3 %v145_v52  ;;  %v576_v53 = vmul.f32 %v339_v51, %v145_v52  ;;  %v389_v51 = vpop.permute.xlu1 %388 }
  0xb7   :  { %865 = vmatmul.f32.vlgmr.msrb.gmra.mxu2 %v576_v53  ;;  %1187 = vmatmul.f32.vlgmr.msrb.gmra.mxu0 %v576_v53 }
  0xb9   :  { %v2238_v62 = vpop.f32.mrf.mxu2 }
  0xba   :  { %v147_v54 = vpop.f32.mrf.mxu0  ;;  %v2236_v59 = vpop.f32.mrf.mxu3 }
  0xbb   :  { %v148_v56 = vadd.f32 %v2230_v49, %v147_v54  ;;  %v2241_v0 = vpop.f32.mrf.mxu1 }
  0xbd   :  { %707 = vmatmul.f32.gmra.mxu1 %v148_v56  ;;  %1029 = vmatmul.f32.gmra.mxu3 %v148_v56  ;;  %v577_v58 = vmul.f32 %v344_v57, %v148_v56 }
  0xbf   :  { %868 = vmatmul.f32.gmra.mxu2 %v577_v58  ;;  %1190 = vmatmul.f32.gmra.mxu0 %v577_v58 }
  0xc1   :  { %v2246_v6 = vpop.f32.mrf.mxu2 }
  0xc2   :  { %v150_v61 = vpop.f32.mrf.mxu0  ;;  %v2243_v3 = vpop.f32.mrf.mxu3 }
  0xc3   :  { %v151_v63 = vadd.f32 %v2230_v49, %v150_v61  ;;  %v2248_v8 = vpop.f32.mrf.mxu1 }
  0xc5   :  { %710 = vmatmul.f32.gmra.mxu1 %v151_v63  ;;  %1032 = vmatmul.f32.gmra.mxu3 %v151_v63  ;;  %v578_v1 = vmul.f32 %v349_v60, %v151_v63  ;;  %v394_v60 = vpop.permute.xlu2 %393  ;;  %v181_v63 = vadd.f32 %v2230_v49, %v2233_v55 }
  0xc7   :  { %871 = vmatmul.f32.gmra.mxu2 %v578_v1  ;;  %1193 = vmatmul.f32.gmra.mxu0 %v578_v1 }
  0xc9   :  { %v2253_v14 = vpop.f32.mrf.mxu2 }
  0xca   :  { %v153_v2 = vpop.f32.mrf.mxu0  ;;  %v2251_v12 = vpop.f32.mrf.mxu3 }
  0xcb   :  { %v154_v4 = vadd.f32 %v2230_v49, %v153_v2  ;;  %v2255_v15 = vpop.f32.mrf.mxu1 }
  0xcd   :  { %713 = vmatmul.f32.gmra.mxu1 %v154_v4  ;;  %1035 = vmatmul.f32.gmra.mxu3 %v154_v4  ;;  %v579_v7 = vmul.f32 %v354_v5, %v154_v4  ;;  %v399_v4 = vpop.permute.xlu0 %398 }
  0xcf   :  { %874 = vmatmul.f32.gmra.mxu2 %v579_v7  ;;  %1196 = vmatmul.f32.gmra.mxu0 %v579_v7  ;;  %v588_v7 = vmul.f32 %v399_v4, %v181_v63 }
  0xd1   :  { %v2260_v21 = vpop.f32.mrf.mxu2 }
  0xd2   :  { %v156_v10 = vpop.f32.mrf.mxu0  ;;  %v2258_v20 = vpop.f32.mrf.mxu3 }
  0xd3   :  { %v157_v11 = vadd.f32 %v2230_v49, %v156_v10  ;;  %v2262_v23 = vpop.f32.mrf.mxu1 }
  0xd5   :  { %716 = vmatmul.f32.gmra.mxu1 %v157_v11  ;;  %1038 = vmatmul.f32.gmra.mxu3 %v157_v11  ;;  %v580_v13 = vmul.f32 %v359_v9, %v157_v11  ;;  %v184_v9 = vadd.f32 %v2230_v49, %v2241_v0  ;;  %v404_v11 = vpop.permute.xlu1 %403 }
  0xd7   :  { %877 = vmatmul.f32.gmra.mxu2 %v580_v13  ;;  %1199 = vmatmul.f32.gmra.mxu0 %v580_v13  ;;  %v589_v55 = vmul.f32 %v404_v11, %v184_v9 }
  0xd9   :  { %v2267_v29 = vpop.f32.mrf.mxu2 }
  0xda   :  { %v159_v16 = vpop.f32.mrf.mxu0  ;;  %v2265_v27 = vpop.f32.mrf.mxu3 }
  0xdb   :  { %v160_v17 = vadd.f32 %v2230_v49, %v159_v16  ;;  %v2270_v32 = vpop.f32.mrf.mxu1 }
  0xdd   :  { %719 = vmatmul.f32.gmra.mxu1 %v160_v17  ;;  %1041 = vmatmul.f32.gmra.mxu3 %v160_v17  ;;  %v581_v19 = vmul.f32 %v364_v18, %v160_v17  ;;  %v187_v17 = vadd.f32 %v2230_v49, %v2248_v8  ;;  %v409_v18 = vpop.permute.xlu2 %408 }
  0xdf   :  { %880 = vmatmul.f32.gmra.mxu2 %v581_v19  ;;  %1202 = vmatmul.f32.gmra.mxu0 %v581_v19  ;;  %v590_v0 = vmul.f32 %v409_v18, %v187_v17 }
  0xe1   :  { %v2275_v38 = vpop.f32.mrf.mxu2 }
  0xe2   :  { %v162_v22 = vpop.f32.mrf.mxu0  ;;  %v2272_v35 = vpop.f32.mrf.mxu3 }
  0xe3   :  { %v163_v24 = vadd.f32 %v2230_v49, %v162_v22  ;;  %v2277_v40 = vpop.f32.mrf.mxu1 }
  0xe5   :  { %722 = vmatmul.f32.gmra.mxu1 %v163_v24  ;;  %1044 = vmatmul.f32.gmra.mxu3 %v163_v24  ;;  %v582_v26 = vmul.f32 %v369_v25, %v163_v24  ;;  %v190_v24 = vadd.f32 %v2230_v49, %v2255_v15 }
  0xe7   :  { %883 = vmatmul.f32.gmra.mxu2 %v582_v26  ;;  %1205 = vmatmul.f32.gmra.mxu0 %v582_v26  ;;  %v414_v26 = vpop.permute.xlu0 %413 }
  0xe9   :  { %v2282_v46 = vpop.f32.mrf.mxu2 }
  0xea   :  { %v165_v28 = vpop.f32.mrf.mxu0  ;;  %v2280_v44 = vpop.f32.mrf.mxu3 }
  0xeb   :  { %v166_v30 = vadd.f32 %v2230_v49, %v165_v28  ;;  %v2284_v47 = vpop.f32.mrf.mxu1  ;;  %v591_v28 = vmul.f32 %v414_v26, %v190_v24 }
  0xed   :  { %725 = vmatmul.f32.gmra.mxu1 %v166_v30  ;;  %1047 = vmatmul.f32.gmra.mxu3 %v166_v30  ;;  %v583_v33 = vmul.f32 %v374_v31, %v166_v30  ;;  %v193_v30 = vadd.f32 %v2230_v49, %v2262_v23 }
  0xef   :  { %886 = vmatmul.f32.gmra.mxu2 %v583_v33  ;;  %1208 = vmatmul.f32.gmra.mxu0 %v583_v33 }
  0xf1   :  { %v2289_v54 = vpop.f32.mrf.mxu2 }
  0xf2   :  { %v168_v34 = vpop.f32.mrf.mxu0  ;;  %v2287_v53 = vpop.f32.mrf.mxu3 }
  0xf3   :  { %v169_v36 = vadd.f32 %v2230_v49, %v168_v34  ;;  %v2291_v57 = vpop.f32.mrf.mxu1 }
  0xf5   :  { %728 = vmatmul.f32.gmra.mxu1 %v169_v36  ;;  %1050 = vmatmul.f32.gmra.mxu3 %v169_v36  ;;  %v584_v39 = vmul.f32 %v379_v37, %v169_v36  ;;  %v419_v36 = vpop.permute.xlu1 %418 }
  0xf6   :  { %v592_v15 = vmul.f32 %v419_v36, %v193_v30  ;;  %v205_v36 = vadd.f32 %v2230_v49, %v2291_v57 }
  0xf7   :  { %889 = vmatmul.f32.gmra.mxu2 %v584_v39  ;;  %1211 = vmatmul.f32.gmra.mxu0 %v584_v39  ;;  %v2329_v39 = vld [vmem:[%s2465_s5] ss:$0 sm:$0xff] }
  0xf9   :  { %v2298_v2 = vpop.f32.mrf.mxu2 }
  0xfa   :  { %v171_v41 = vpop.f32.mrf.mxu0  ;;  %v2296_v1 = vpop.f32.mrf.mxu3 }
  0xfb   :  { %v172_v42 = vadd.f32 %v2230_v49, %v171_v41  ;;  %v2300_v5 = vpop.f32.mrf.mxu1  ;;  %v196_v41 = vadd.f32 %v2230_v49, %v2270_v32 }
  0xfc   :  { %v208_v57 = vadd.f32 %v2230_v49, %v2300_v5 }
  0xfd   :  { %731 = vmatmul.f32.gmra.mxu1 %v172_v42  ;;  %1053 = vmatmul.f32.gmra.mxu3 %v172_v42  ;;  %v585_v45 = vmul.f32 %v384_v43, %v172_v42  ;;  %v434_v26 = vpop.permute.xlu1 %433 }
  0xff   :  { %892 = vmatmul.f32.gmra.mxu2 %v585_v45  ;;  %1214 = vmatmul.f32.gmra.mxu0 %v585_v45  ;;  %v424_v45 = vpop.permute.xlu2 %423 }
 0x101   :  { %v2306_v13 = vpop.f32.mrf.mxu2 }
 0x102   :  { %v174_v48 = vpop.f32.mrf.mxu0  ;;  %v2304_v10 = vpop.f32.mrf.mxu3 }
 0x103   :  { %v175_v50 = vadd.f32 %v2230_v49, %v174_v48  ;;  %v2308_v16 = vpop.f32.mrf.mxu1 }
 0x105   :  { %734 = vmatmul.f32.gmra.mxu1 %v175_v50  ;;  %1056 = vmatmul.f32.gmra.mxu3 %v175_v50  ;;  %v586_v52 = vmul.f32 %v389_v51, %v175_v50  ;;  %v593_v51 = vmul.f32 %v424_v45, %v196_v41 }
 0x107   :  { %895 = vmatmul.f32.gmra.mxu2 %v586_v52  ;;  %1217 = vmatmul.f32.gmra.mxu0 %v586_v52 }
 0x109   :  { %v2314_v22 = vpop.f32.mrf.mxu2 }
 0x10a   :  { %v177_v56 = vpop.f32.mrf.mxu0  ;;  %v2312_v19 = vpop.f32.mrf.mxu3 }
 0x10b   :  { %v178_v58 = vadd.f32 %v2230_v49, %v177_v56  ;;  %v2318_v25 = vpop.f32.mrf.mxu1  ;;  %v199_v56 = vadd.f32 %v2230_v49, %v2277_v40  ;;  %v202_v40 = vadd.f32 %v2230_v49, %v2284_v47 }
 0x10d   :  { %737 = vmatmul.f32.gmra.mxu1 %v178_v58  ;;  %1059 = vmatmul.f32.gmra.mxu3 %v178_v58  ;;  %v587_v61 = vmul.f32 %v394_v60, %v178_v58 }
 0x10f   :  { %898 = vmatmul.f32.gmra.mxu2 %v587_v61  ;;  %1220 = vmatmul.f32.gmra.mxu0 %v587_v61 }
 0x111   :  { %v2324_v31 = vpop.f32.mrf.mxu2 }
 0x112   :  { %v2320_v8 = vpop.f32.mrf.mxu3 }
 0x115   :  { %740 = vmatmul.f32.gmra.mxu1 %v181_v63  ;;  %1062 = vmatmul.f32.gmra.mxu3 %v181_v63 }
 0x117   :  { %901 = vmatmul.f32.gmra.mxu2 %v588_v7  ;;  %1223 = vmatmul.f32.gmra.mxu0 %v588_v7  ;;  %v429_v7 = vpop.permute.xlu0 %428 }
 0x11d   :  { %743 = vmatmul.f32.gmra.mxu1 %v184_v9  ;;  %1065 = vmatmul.f32.gmra.mxu3 %v184_v9 }
 0x11f   :  { %904 = vmatmul.f32.gmra.mxu2 %v589_v55  ;;  %1226 = vmatmul.f32.gmra.mxu0 %v589_v55  ;;  %v594_v55 = vmul.f32 %v429_v7, %v199_v56  ;;  %v211_v7 = vadd.f32 %v2230_v49, %v2308_v16  ;;  %v214_v16 = vadd.f32 %v2230_v49, %v2318_v25 }
 0x125   :  { %746 = vmatmul.f32.gmra.mxu1 %v187_v17  ;;  %1068 = vmatmul.f32.gmra.mxu3 %v187_v17 }
 0x127   :  { %907 = vmatmul.f32.gmra.mxu2 %v590_v0  ;;  %1229 = vmatmul.f32.gmra.mxu0 %v590_v0 }
 0x12d   :  { %749 = vmatmul.f32.gmra.mxu1 %v190_v24  ;;  %1071 = vmatmul.f32.gmra.mxu3 %v190_v24 }
 0x12f   :  { %910 = vmatmul.f32.gmra.mxu2 %v591_v28  ;;  %1232 = vmatmul.f32.gmra.mxu0 %v591_v28 }
 0x132   :  { %v705_v33 = vpop.f32.mrf.mxu1 }
 0x134   :  { %v1188_v34 = vpop.f32.mrf.mxu0 }
 0x135   :  { %752 = vmatmul.f32.gmra.mxu1 %v193_v30  ;;  %1074 = vmatmul.f32.gmra.mxu3 %v193_v30 }
 0x137   :  { %913 = vmatmul.f32.gmra.mxu2 %v592_v15  ;;  %1235 = vmatmul.f32.gmra.mxu0 %v592_v15 }
 0x138   :  { %v1027_v37 = vpop.f32.mrf.mxu3 }
 0x139   :  { %v1189_v58 = vadd.f32 %v1188_v34, %v1027_v37 }
 0x13a   :  { %v866_v23 = vpop.f32.mrf.mxu2  ;;  %v708_v42 = vpop.f32.mrf.mxu1 }
 0x13b   :  { %v867_v43 = vadd.f32 %v866_v23, %v705_v33  ;;  %v595_v33 = vmul.f32 %v434_v26, %v202_v40 }
 0x13c   :  { %v1191_v50 = vpop.f32.mrf.mxu0 }
 0x13d   :  { %v1336_v48 = vadd.f32 %v2329_v39, %v867_v43  ;;  %755 = vmatmul.f32.gmra.mxu1 %v196_v41  ;;  %1077 = vmatmul.f32.gmra.mxu3 %v196_v41  ;;  %v439_v43 = vpop.permute.xlu2 %438 }
 0x13f   :  { %1384 = vst [vmem:[#allocation8] sm:$0xff] %v1336_v48  ;;  %916 = vmatmul.f32.gmra.mxu2 %v593_v51  ;;  %1238 = vmatmul.f32.gmra.mxu0 %v593_v51 }
 0x140   :  { %v1030_v52 = vpop.f32.mrf.mxu3 }
 0x141   :  { %v1192_v60 = vadd.f32 %v1191_v50, %v1030_v52  ;;  %v596_v50 = vmul.f32 %v439_v43, %v205_v36 }
 0x142   :  { %v711_v32 = vpop.f32.mrf.mxu1  ;;  %v869_v61 = vpop.f32.mrf.mxu2 }
 0x143   :  { %v1569_v63 = vpack.c.bf16 %v1192_v60, %v1189_v58  ;;  %v870_v4 = vadd.f32 %v869_v61, %v708_v42  ;;  %v444_v60 = vpop.permute.xlu0 %443 }
 0x144   :  { %v1194_v9 = vpop.f32.mrf.mxu0 }
 0x145   :  { %1570 = vst [vmem:[#allocation7] sm:$0xff] %v1569_v63   ;;  %v1337_v11 = vadd.f32 %v2329_v39, %v870_v4  ;;  %758 = vmatmul.f32.gmra.mxu1 %v199_v56  ;;  %1080 = vmatmul.f32.gmra.mxu3 %v199_v56  ;;  %v597_v63 = vmul.f32 %v444_v60, %v208_v57 }
 0x147   :  { %1385 = vst [vmem:[#allocation8 + $0x8] sm:$0xff] %v1337_v11  ;;  %919 = vmatmul.f32.gmra.mxu2 %v594_v55  ;;  %1241 = vmatmul.f32.gmra.mxu0 %v594_v55 }
 0x148   :  { %v1033_v17 = vpop.f32.mrf.mxu3 }
 0x149   :  { %v1195_v15 = vadd.f32 %v1194_v9, %v1033_v17 }
 0x14a   :  { %v714_v18 = vpop.f32.mrf.mxu1  ;;  %v872_v0 = vpop.f32.mrf.mxu2 }
 0x14b   :  { %v873_v24 = vadd.f32 %v872_v0, %v711_v32 }
 0x14c   :  { %v1197_v28 = vpop.f32.mrf.mxu0 }
 0x14d   :  { %v1338_v30 = vadd.f32 %v2329_v39, %v873_v24  ;;  %761 = vmatmul.f32.gmra.mxu1 %v202_v40  ;;  %1083 = vmatmul.f32.gmra.mxu3 %v202_v40 }
 0x14f   :  { %1386 = vst [vmem:[#allocation8 + $0x10] sm:$0xff] %v1338_v30  ;;  %922 = vmatmul.f32.gmra.mxu2 %v595_v33  ;;  %1244 = vmatmul.f32.gmra.mxu0 %v595_v33 }
 0x150   :  { %v1036_v34 = vpop.f32.mrf.mxu3 }
 0x151   :  { %v1198_v37 = vadd.f32 %v1197_v28, %v1036_v34 }
 0x152   :  { %v717_v47 = vpop.f32.mrf.mxu1  ;;  %v875_v41 = vpop.f32.mrf.mxu2 }
 0x153   :  { %v1574_v23 = vpack.c.bf16 %v1198_v37, %v1195_v15  ;;  %v876_v42 = vadd.f32 %v875_v41, %v714_v18  ;;  %v449_v18 = vpop.permute.xlu1 %448 }
 0x154   :  { %v1200_v45 = vpop.f32.mrf.mxu0  ;;  %v598_v26 = vmul.f32 %v449_v18, %v211_v7 }
 0x155   :  { %1686 = vst [vmem:[#allocation7 + $0x8] sm:$0xff] %v1574_v23   ;;  %v1339_v48 = vadd.f32 %v2329_v39, %v876_v42  ;;  %764 = vmatmul.f32.gmra.mxu1 %v205_v36  ;;  %1086 = vmatmul.f32.gmra.mxu3 %v205_v36  ;;  %v454_v36 = vpop.permute.xlu2 %453  ;;  %v217_v23 = vadd.f32 %v2230_v49, %v2238_v62  ;;  %v459_v42 = vpop.permute.xlu0 %458 }
 0x156   :  { %v220_v62 = vadd.f32 %v2230_v49, %v2246_v6 }
 0x157   :  { %1387 = vst [vmem:[#allocation8 + $0x18] sm:$0xff] %v1339_v48  ;;  %925 = vmatmul.f32.gmra.mxu2 %v596_v50  ;;  %1247 = vmatmul.f32.gmra.mxu0 %v596_v50 }
 0x158   :  { %v1039_v51 = vpop.f32.mrf.mxu3 }
 0x159   :  { %v1201_v9 = vadd.f32 %v1200_v45, %v1039_v51 }
 0x15a   :  { %v720_v52 = vpop.f32.mrf.mxu1  ;;  %v878_v56 = vpop.f32.mrf.mxu2 }
 0x15b   :  { %v879_v58 = vadd.f32 %v878_v56, %v717_v47  ;;  %v599_v47 = vmul.f32 %v454_v36, %v214_v16  ;;  %v464_v60 = vpop.permute.xlu1 %463 }
 0x15c   :  { %v1203_v32 = vpop.f32.mrf.mxu0 }
 0x15d   :  { %v1340_v61 = vadd.f32 %v2329_v39, %v879_v58  ;;  %767 = vmatmul.f32.gmra.mxu1 %v208_v57  ;;  %1089 = vmatmul.f32.gmra.mxu3 %v208_v57 }
 0x15f   :  { %1388 = vst [vmem:[#allocation8 + $0x20] sm:$0xff] %v1340_v61  ;;  %928 = vmatmul.f32.gmra.mxu2 %v597_v63  ;;  %1250 = vmatmul.f32.gmra.mxu0 %v597_v63 }
 0x160   :  { %v1042_v4 = vpop.f32.mrf.mxu3 }
 0x161   :  { %v1204_v11 = vadd.f32 %v1203_v32, %v1042_v4 }
 0x162   :  { %v723_v5 = vpop.f32.mrf.mxu1  ;;  %v881_v55 = vpop.f32.mrf.mxu2 }
 0x163   :  { %v1579_v17 = vpack.c.bf16 %v1204_v11, %v1201_v9  ;;  %v882_v40 = vadd.f32 %v881_v55, %v720_v52  ;;  %v600_v52 = vmul.f32 %v459_v42, %v217_v23  ;;  %v229_v42 = vadd.f32 %v2230_v49, %v2267_v29 }
 0x164   :  { %v1206_v0 = vpop.f32.mrf.mxu0  ;;  %v232_v29 = vadd.f32 %v2230_v49, %v2275_v38 }
 0x165   :  { %1687 = vst [vmem:[#allocation7 + $0x10] sm:$0xff] %v1579_v17   ;;  %v1341_v24 = vadd.f32 %v2329_v39, %v882_v40  ;;  %770 = vmatmul.f32.gmra.mxu1 %v211_v7  ;;  %1092 = vmatmul.f32.gmra.mxu3 %v211_v7  ;;  %v601_v7 = vmul.f32 %v464_v60, %v220_v62 }
 0x167   :  { %1389 = vst [vmem:[#allocation8 + $0x28] sm:$0xff] %v1341_v24  ;;  %931 = vmatmul.f32.gmra.mxu2 %v598_v26  ;;  %1253 = vmatmul.f32.gmra.mxu0 %v598_v26  ;;  %v469_v24 = vpop.permute.xlu2 %468 }
 0x168   :  { %v1045_v28 = vpop.f32.mrf.mxu3 }
 0x169   :  { %v1207_v43 = vadd.f32 %v1206_v0, %v1045_v28 }
 0x16a   :  { %v726_v30 = vpop.f32.mrf.mxu1  ;;  %v884_v33 = vpop.f32.mrf.mxu2 }
 0x16b   :  { %v885_v34 = vadd.f32 %v884_v33, %v723_v5  ;;  %v223_v5 = vadd.f32 %v2230_v49, %v2253_v14  ;;  %v226_v14 = vadd.f32 %v2230_v49, %v2260_v21 }
 0x16c   :  { %v1209_v15 = vpop.f32.mrf.mxu0 }
 0x16d   :  { %v1342_v37 = vadd.f32 %v2329_v39, %v885_v34  ;;  %773 = vmatmul.f32.gmra.mxu1 %v214_v16  ;;  %1095 = vmatmul.f32.gmra.mxu3 %v214_v16  ;;  %v602_v16 = vmul.f32 %v469_v24, %v223_v5 }
 0x16f   :  { %1390 = vst [vmem:[#allocation8 + $0x30] sm:$0xff] %v1342_v37  ;;  %934 = vmatmul.f32.gmra.mxu2 %v599_v47  ;;  %1256 = vmatmul.f32.gmra.mxu0 %v599_v47 }
 0x170   :  { %v1048_v41 = vpop.f32.mrf.mxu3 }
 0x171   :  { %v1210_v25 = vadd.f32 %v1209_v15, %v1048_v41  ;;  %v474_v15 = vpop.permute.xlu0 %473 }
 0x172   :  { %v729_v45 = vpop.f32.mrf.mxu1  ;;  %v887_v48 = vpop.f32.mrf.mxu2  ;;  %v603_v41 = vmul.f32 %v474_v15, %v226_v14 }
 0x173   :  { %v1584_v50 = vpack.c.bf16 %v1210_v25, %v1207_v43  ;;  %v888_v51 = vadd.f32 %v887_v48, %v726_v30 }
 0x174   :  { %v1212_v57 = vpop.f32.mrf.mxu0 }
 0x175   :  { %1688 = vst [vmem:[#allocation7 + $0x18] sm:$0xff] %v1584_v50   ;;  %v1343_v56 = vadd.f32 %v2329_v39, %v888_v51  ;;  %776 = vmatmul.f32.gmra.mxu1 %v217_v23  ;;  %1098 = vmatmul.f32.gmra.mxu3 %v217_v23  ;;  %v479_v51 = vpop.permute.xlu1 %478 }
 0x177   :  { %1391 = vst [vmem:[#allocation8 + $0x38] sm:$0xff] %v1343_v56  ;;  %937 = vmatmul.f32.gmra.mxu2 %v600_v52  ;;  %1259 = vmatmul.f32.gmra.mxu0 %v600_v52  ;;  %v604_v56 = vmul.f32 %v479_v51, %v229_v42 }
 0x178   :  { %v1051_v58 = vpop.f32.mrf.mxu3 }
 0x179   :  { %v1213_v55 = vadd.f32 %v1212_v57, %v1051_v58 }
 0x17a   :  { %v732_v32 = vpop.f32.mrf.mxu1  ;;  %v890_v61 = vpop.f32.mrf.mxu2 }
 0x17b   :  { %v891_v63 = vadd.f32 %v890_v61, %v729_v45  ;;  %v484_v61 = vpop.permute.xlu2 %483 }
 0x17c   :  { %v1215_v4 = vpop.f32.mrf.mxu0 }
 0x17d   :  { %v1344_v9 = vadd.f32 %v2329_v39, %v891_v63  ;;  %779 = vmatmul.f32.gmra.mxu1 %v220_v62  ;;  %1101 = vmatmul.f32.gmra.mxu3 %v220_v62 }
 0x17f   :  { %1392 = vst [vmem:[#allocation8 + $0x40] sm:$0xff] %v1344_v9  ;;  %940 = vmatmul.f32.gmra.mxu2 %v601_v7  ;;  %1262 = vmatmul.f32.gmra.mxu0 %v601_v7  ;;  %v605_v7 = vmul.f32 %v484_v61, %v232_v29  ;;  %v247_v61 = vadd.f32 %v2230_v49, %v2314_v22 }
 0x180   :  { %v1054_v11 = vpop.f32.mrf.mxu3  ;;  %v250_v22 = vadd.f32 %v2230_v49, %v2324_v31  ;;  %v253_v31 = vadd.f32 %v2230_v49, %v2236_v59 }
 0x181   :  { %v1216_v17 = vadd.f32 %v1215_v4, %v1054_v11  ;;  %v235_v11 = vadd.f32 %v2230_v49, %v2282_v46  ;;  %v238_v46 = vadd.f32 %v2230_v49, %v2289_v54 }
 0x182   :  { %v735_v6 = vpop.f32.mrf.mxu1  ;;  %v893_v40 = vpop.f32.mrf.mxu2 }
 0x183   :  { %v1589_v18 = vpack.c.bf16 %v1216_v17, %v1213_v55  ;;  %v894_v0 = vadd.f32 %v893_v40, %v732_v32 }
 0x184   :  { %v1218_v26 = vpop.f32.mrf.mxu0 }
 0x185   :  { %1689 = vst [vmem:[#allocation7 + $0x20] sm:$0xff] %v1589_v18   ;;  %v1345_v28 = vadd.f32 %v2329_v39, %v894_v0  ;;  %782 = vmatmul.f32.gmra.mxu1 %v223_v5  ;;  %1104 = vmatmul.f32.gmra.mxu3 %v223_v5  ;;  %v489_v18 = vpop.permute.xlu0 %488 }
 0x187   :  { %1393 = vst [vmem:[#allocation8 + $0x48] sm:$0xff] %v1345_v28  ;;  %943 = vmatmul.f32.gmra.mxu2 %v602_v16  ;;  %1265 = vmatmul.f32.gmra.mxu0 %v602_v16 }
 0x188   :  { %v1057_v30 = vpop.f32.mrf.mxu3 }
 0x189   :  { %v1219_v43 = vadd.f32 %v1218_v26, %v1057_v30  ;;  %v606_v26 = vmul.f32 %v489_v18, %v235_v11 }
 0x18a   :  { %v738_v33 = vpop.f32.mrf.mxu1  ;;  %v896_v34 = vpop.f32.mrf.mxu2 }
 0x18b   :  { %v897_v36 = vadd.f32 %v896_v34, %v735_v6 }
 0x18c   :  { %v1221_v37 = vpop.f32.mrf.mxu0 }
 0x18d   :  { %v1346_v47 = vadd.f32 %v2329_v39, %v897_v36  ;;  %785 = vmatmul.f32.gmra.mxu1 %v226_v14  ;;  %1107 = vmatmul.f32.gmra.mxu3 %v226_v14 }
 0x18f   :  { %1394 = vst [vmem:[#allocation8 + $0x50] sm:$0xff] %v1346_v47  ;;  %946 = vmatmul.f32.gmra.mxu2 %v603_v41  ;;  %1268 = vmatmul.f32.gmra.mxu0 %v603_v41  ;;  %v241_v47 = vadd.f32 %v2230_v49, %v2298_v2  ;;  %v244_v2 = vadd.f32 %v2230_v49, %v2306_v13 }
 0x190   :  { %v1060_v23 = vpop.f32.mrf.mxu3 }
 0x191   :  { %v1222_v25 = vadd.f32 %v1221_v37, %v1060_v23 }
 0x192   :  { %v741_v21 = vpop.f32.mrf.mxu1  ;;  %v899_v45 = vpop.f32.mrf.mxu2 }
 0x193   :  { %v1594_v48 = vpack.c.bf16 %v1222_v25, %v1219_v43  ;;  %v900_v50 = vadd.f32 %v899_v45, %v738_v33  ;;  %v494_v33 = vpop.permute.xlu1 %493 }
 0x194   :  { %v1224_v57 = vpop.f32.mrf.mxu0  ;;  %v607_v15 = vmul.f32 %v494_v33, %v238_v46 }
 0x195   :  { %1690 = vst [vmem:[#allocation7 + $0x28] sm:$0xff] %v1594_v48   ;;  %v1347_v52 = vadd.f32 %v2329_v39, %v900_v50  ;;  %788 = vmatmul.f32.gmra.mxu1 %v229_v42  ;;  %1110 = vmatmul.f32.gmra.mxu3 %v229_v42 }
 0x197   :  { %1395 = vst [vmem:[#allocation8 + $0x58] sm:$0xff] %v1347_v52  ;;  %949 = vmatmul.f32.gmra.mxu2 %v604_v56  ;;  %1271 = vmatmul.f32.gmra.mxu0 %v604_v56 }
 0x198   :  { %v1063_v58 = vpop.f32.mrf.mxu3 }
 0x199   :  { %v1225_v5 = vadd.f32 %v1224_v57, %v1063_v58  ;;  %v504_v58 = vpop.permute.xlu0 %503 }
 0x19a   :  { %v744_v62 = vpop.f32.mrf.mxu1  ;;  %v902_v60 = vpop.f32.mrf.mxu2 }
 0x19b   :  { %v903_v32 = vadd.f32 %v902_v60, %v741_v21  ;;  %v499_v21 = vpop.permute.xlu2 %498  ;;  %v609_v60 = vmul.f32 %v504_v58, %v244_v2 }
 0x19c   :  { %v1227_v63 = vpop.f32.mrf.mxu0  ;;  %v608_v50 = vmul.f32 %v499_v21, %v241_v47  ;;  %v256_v21 = vadd.f32 %v2230_v49, %v2243_v3 }
 0x19d   :  { %v1348_v4 = vadd.f32 %v2329_v39, %v903_v32  ;;  %791 = vmatmul.f32.gmra.mxu1 %v232_v29  ;;  %1113 = vmatmul.f32.gmra.mxu3 %v232_v29 }
 0x19f   :  { %1396 = vst [vmem:[#allocation8 + $0x60] sm:$0xff] %v1348_v4  ;;  %952 = vmatmul.f32.gmra.mxu2 %v605_v7  ;;  %1274 = vmatmul.f32.gmra.mxu0 %v605_v7 }
 0x1a0   :  { %v1066_v9 = vpop.f32.mrf.mxu3 }
 0x1a1   :  { %v1228_v55 = vadd.f32 %v1227_v63, %v1066_v9 }
 0x1a2   :  { %v747_v38 = vpop.f32.mrf.mxu1  ;;  %v905_v17 = vpop.f32.mrf.mxu2 }
 0x1a3   :  { %v1599_v6 = vpack.c.bf16 %v1228_v55, %v1225_v5  ;;  %v906_v40 = vadd.f32 %v905_v17, %v744_v62  ;;  %v509_v5 = vpop.permute.xlu1 %508 }
 0x1a4   :  { %v1230_v0 = vpop.f32.mrf.mxu0  ;;  %v610_v17 = vmul.f32 %v509_v5, %v247_v61 }
 0x1a5   :  { %1691 = vst [vmem:[#allocation7 + $0x30] sm:$0xff] %v1599_v6   ;;  %v1349_v24 = vadd.f32 %v2329_v39, %v906_v40  ;;  %794 = vmatmul.f32.gmra.mxu1 %v235_v11  ;;  %1116 = vmatmul.f32.gmra.mxu3 %v235_v11 }
 0x1a7   :  { %1397 = vst [vmem:[#allocation8 + $0x68] sm:$0xff] %v1349_v24  ;;  %955 = vmatmul.f32.gmra.mxu2 %v606_v26  ;;  %1277 = vmatmul.f32.gmra.mxu0 %v606_v26  ;;  %v514_v24 = vpop.permute.xlu2 %513 }
 0x1a8   :  { %v1069_v28 = vpop.f32.mrf.mxu3 }
 0x1a9   :  { %v1231_v41 = vadd.f32 %v1230_v0, %v1069_v28 }
 0x1aa   :  { %v750_v16 = vpop.f32.mrf.mxu1  ;;  %v908_v30 = vpop.f32.mrf.mxu2 }
 0x1ab   :  { %v909_v14 = vadd.f32 %v908_v30, %v747_v38  ;;  %v519_v30 = vpop.permute.xlu0 %518 }
 0x1ac   :  { %v1233_v34 = vpop.f32.mrf.mxu0 }
 0x1ad   :  { %v1350_v36 = vadd.f32 %v2329_v39, %v909_v14  ;;  %797 = vmatmul.f32.gmra.mxu1 %v238_v46  ;;  %1119 = vmatmul.f32.gmra.mxu3 %v238_v46  ;;  %v611_v46 = vmul.f32 %v514_v24, %v250_v22 }
 0x1af   :  { %1398 = vst [vmem:[#allocation8 + $0x70] sm:$0xff] %v1350_v36  ;;  %958 = vmatmul.f32.gmra.mxu2 %v607_v15  ;;  %1280 = vmatmul.f32.gmra.mxu0 %v607_v15 }
 0x1b0   :  { %v1072_v37 = vpop.f32.mrf.mxu3 }
 0x1b1   :  { %v1234_v23 = vadd.f32 %v1233_v34, %v1072_v37 }
 0x1b2   :  { %v753_v54 = vpop.f32.mrf.mxu1  ;;  %v911_v42 = vpop.f32.mrf.mxu2 }
 0x1b3   :  { %v1604_v43 = vpack.c.bf16 %v1234_v23, %v1231_v41  ;;  %v912_v25 = vadd.f32 %v911_v42, %v750_v16  ;;  %v612_v41 = vmul.f32 %v519_v30, %v253_v31  ;;  %v524_v42 = vpop.permute.xlu1 %523 }
 0x1b4   :  { %v1236_v45 = vpop.f32.mrf.mxu0 }
 0x1b5   :  { %1692 = vst [vmem:[#allocation7 + $0x38] sm:$0xff] %v1604_v43   ;;  %v1351_v48 = vadd.f32 %v2329_v39, %v912_v25  ;;  %800 = vmatmul.f32.gmra.mxu1 %v241_v47  ;;  %1122 = vmatmul.f32.gmra.mxu3 %v241_v47 }
 0x1b7   :  { %1399 = vst [vmem:[#allocation8 + $0x78] sm:$0xff] %v1351_v48  ;;  %961 = vmatmul.f32.gmra.mxu2 %v608_v50  ;;  %1283 = vmatmul.f32.gmra.mxu0 %v608_v50  ;;  %v613_v48 = vmul.f32 %v524_v42, %v256_v21 }
 0x1b8   :  { %v1075_v51 = vpop.f32.mrf.mxu3 }
 0x1b9   :  { %v1237_v63 = vadd.f32 %v1236_v45, %v1075_v51 }
 0x1ba   :  { %v756_v57 = vpop.f32.mrf.mxu1  ;;  %v914_v52 = vpop.f32.mrf.mxu2 }
 0x1bb   :  { %v915_v56 = vadd.f32 %v914_v52, %v753_v54 }
 0x1bc   :  { %v1239_v29 = vpop.f32.mrf.mxu0 }
 0x1bd   :  { %v1352_v62 = vadd.f32 %v2329_v39, %v915_v56  ;;  %803 = vmatmul.f32.gmra.mxu1 %v244_v2  ;;  %1125 = vmatmul.f32.gmra.mxu3 %v244_v2  ;;  %v259_v2 = vadd.f32 %v2230_v49, %v2251_v12  ;;  %v2400_v49 = vld [vmem:[%s2463_s3] ss:$0 sm:$0xff] }
 0x1be   :  { %v262_v12 = vadd.f32 %v2400_v49, %v2258_v20 }
 0x1bf   :  { %1400 = vst [vmem:[#allocation8 + $0x80] sm:$0xff] %v1352_v62  ;;  %964 = vmatmul.f32.gmra.mxu2 %v609_v60  ;;  %1286 = vmatmul.f32.gmra.mxu0 %v609_v60  ;;  %v529_v62 = vpop.permute.xlu2 %528 }
 0x1c0   :  { %v1078_v32 = vpop.f32.mrf.mxu3 }
 0x1c1   :  { %v1240_v4 = vadd.f32 %v1239_v29, %v1078_v32  ;;  %v614_v32 = vmul.f32 %v529_v62, %v259_v2 }
 0x1c2   :  { %v759_v13 = vpop.f32.mrf.mxu1  ;;  %v917_v7 = vpop.f32.mrf.mxu2 }
 0x1c3   :  { %v1609_v9 = vpack.c.bf16 %v1240_v4, %v1237_v63  ;;  %v918_v11 = vadd.f32 %v917_v7, %v756_v57  ;;  %v534_v4 = vpop.permute.xlu0 %533 }
 0x1c4   :  { %v1242_v55 = vpop.f32.mrf.mxu0  ;;  %v615_v5 = vmul.f32 %v534_v4, %v262_v12 }
 0x1c5   :  { %1693 = vst [vmem:[#allocation7 + $0x40] sm:$0xff] %v1609_v9   ;;  %v1353_v38 = vadd.f32 %v2329_v39, %v918_v11  ;;  %806 = vmatmul.f32.gmra.mxu1 %v247_v61  ;;  %1128 = vmatmul.f32.gmra.mxu3 %v247_v61 }
 0x1c7   :  { %1401 = vst [vmem:[#allocation8 + $0x88] sm:$0xff] %v1353_v38  ;;  %967 = vmatmul.f32.gmra.mxu2 %v610_v17  ;;  %1289 = vmatmul.f32.gmra.mxu0 %v610_v17  ;;  %v265_v17 = vadd.f32 %v2400_v49, %v2265_v27  ;;  %v268_v27 = vadd.f32 %v2400_v49, %v2272_v35 }
 0x1c8   :  { %v1081_v6 = vpop.f32.mrf.mxu3 }
 0x1c9   :  { %v1243_v14 = vadd.f32 %v1242_v55, %v1081_v6  ;;  %v539_v6 = vpop.permute.xlu1 %538 }
 0x1ca   :  { %v762_v40 = vpop.f32.mrf.mxu1  ;;  %v920_v18 = vpop.f32.mrf.mxu2 }
 0x1cb   :  { %v921_v0 = vadd.f32 %v920_v18, %v759_v13 }
 0x1cc   :  { %v1245_v26 = vpop.f32.mrf.mxu0 }
 0x1cd   :  { %v1354_v28 = vadd.f32 %v2329_v39, %v921_v0  ;;  %809 = vmatmul.f32.gmra.mxu1 %v250_v22  ;;  %1131 = vmatmul.f32.gmra.mxu3 %v250_v22 }
 0x1cf   :  { %1402 = vst [vmem:[#allocation8 + $0x90] sm:$0xff] %v1354_v28  ;;  %970 = vmatmul.f32.gmra.mxu2 %v611_v46  ;;  %1292 = vmatmul.f32.gmra.mxu0 %v611_v46  ;;  %v616_v28 = vmul.f32 %v539_v6, %v265_v17 }
 0x1d0   :  { %v1084_v16 = vpop.f32.mrf.mxu3 }
 0x1d1   :  { %v1246_v33 = vadd.f32 %v1245_v26, %v1084_v16 }
 0x1d2   :  { %v765_v34 = vpop.f32.mrf.mxu1  ;;  %v923_v36 = vpop.f32.mrf.mxu2 }
 0x1d3   :  { %v1614_v15 = vpack.c.bf16 %v1246_v33, %v1243_v14  ;;  %v924_v37 = vadd.f32 %v923_v36, %v762_v40 }
 0x1d4   :  { %v1248_v47 = vpop.f32.mrf.mxu0 }
 0x1d5   :  { %1694 = vst [vmem:[#allocation7 + $0x48] sm:$0xff] %v1614_v15   ;;  %v1355_v23 = vadd.f32 %v2329_v39, %v924_v37  ;;  %812 = vmatmul.f32.gmra.mxu1 %v253_v31  ;;  %1134 = vmatmul.f32.gmra.mxu3 %v253_v31 }
 0x1d7   :  { %1403 = vst [vmem:[#allocation8 + $0x98] sm:$0xff] %v1355_v23  ;;  %973 = vmatmul.f32.gmra.mxu2 %v612_v41  ;;  %1295 = vmatmul.f32.gmra.mxu0 %v612_v41  ;;  %v549_v41 = vpop.permute.xlu0 %548 }
 0x1d8   :  { %v1087_v54 = vpop.f32.mrf.mxu3 }
 0x1d9   :  { %v1249_v57 = vadd.f32 %v1248_v47, %v1087_v54  ;;  %v271_v47 = vadd.f32 %v2400_v49, %v2280_v44  ;;  %v274_v44 = vadd.f32 %v2400_v49, %v2287_v53 }
 0x1da   :  { %v768_v43 = vpop.f32.mrf.mxu1  ;;  %v926_v25 = vpop.f32.mrf.mxu2 }
 0x1db   :  { %v927_v59 = vadd.f32 %v926_v25, %v765_v34  ;;  %v544_v34 = vpop.permute.xlu2 %543 }
 0x1dc   :  { %v1251_v45 = vpop.f32.mrf.mxu0  ;;  %v617_v15 = vmul.f32 %v544_v34, %v268_v27 }
 0x1dd   :  { %v1356_v50 = vadd.f32 %v2329_v39, %v927_v59  ;;  %815 = vmatmul.f32.gmra.mxu1 %v256_v21  ;;  %1137 = vmatmul.f32.gmra.mxu3 %v256_v21  ;;  %v618_v59 = vmul.f32 %v549_v41, %v271_v47 }
 0x1df   :  { %1404 = vst [vmem:[#allocation8 + $0xa0] sm:$0xff] %v1356_v50  ;;  %976 = vmatmul.f32.gmra.mxu2 %v613_v48  ;;  %1298 = vmatmul.f32.gmra.mxu0 %v613_v48  ;;  %v554_v50 = vpop.permute.xlu1 %553 }
 0x1e0   :  { %v1090_v51 = vpop.f32.mrf.mxu3 }
 0x1e1   :  { %v1252_v52 = vadd.f32 %v1251_v45, %v1090_v51 }
 0x1e2   :  { %v771_v56 = vpop.f32.mrf.mxu1  ;;  %v929_v58 = vpop.f32.mrf.mxu2 }
 0x1e3   :  { %v1619_v29 = vpack.c.bf16 %v1252_v52, %v1249_v57  ;;  %v930_v3 = vadd.f32 %v929_v58, %v768_v43 }
 0x1e4   :  { %v1254_v60 = vpop.f32.mrf.mxu0 }
 0x1e5   :  { %1695 = vst [vmem:[#allocation7 + $0x50] sm:$0xff] %v1619_v29   ;;  %v1357_v61 = vadd.f32 %v2329_v39, %v930_v3  ;;  %818 = vmatmul.f32.gmra.mxu1 %v259_v2  ;;  %1140 = vmatmul.f32.gmra.mxu3 %v259_v2  ;;  %v277_v3 = vadd.f32 %v2400_v49, %v2296_v1 }
 0x1e6   :  { %v280_v1 = vadd.f32 %v2400_v49, %v2304_v10 }
 0x1e7   :  { %1405 = vst [vmem:[#allocation8 + $0xa8] sm:$0xff] %v1357_v61  ;;  %979 = vmatmul.f32.gmra.mxu2 %v614_v32  ;;  %1301 = vmatmul.f32.gmra.mxu0 %v614_v32 }
 0x1e8   :  { %v1093_v63 = vpop.f32.mrf.mxu3 }
 0x1e9   :  { %v1255_v22 = vadd.f32 %v1254_v60, %v1093_v63 }
 0x1ea   :  { %v774_v13 = vpop.f32.mrf.mxu1  ;;  %v932_v7 = vpop.f32.mrf.mxu2 }
 0x1eb   :  { %v933_v9 = vadd.f32 %v932_v7, %v771_v56  ;;  %v619_v56 = vmul.f32 %v554_v50, %v274_v44 }
 0x1ec   :  { %v1257_v11 = vpop.f32.mrf.mxu0 }
 0x1ed   :  { %v1358_v55 = vadd.f32 %v2329_v39, %v933_v9  ;;  %821 = vmatmul.f32.gmra.mxu1 %v262_v12  ;;  %1143 = vmatmul.f32.gmra.mxu3 %v262_v12  ;;  %v559_v12 = vpop.permute.xlu2 %558 }
 0x1ee   :  { %v620_v7 = vmul.f32 %v559_v12, %v277_v3 }
 0x1ef   :  { %1406 = vst [vmem:[#allocation8 + $0xb0] sm:$0xff] %v1358_v55  ;;  %982 = vmatmul.f32.gmra.mxu2 %v615_v5  ;;  %1304 = vmatmul.f32.gmra.mxu0 %v615_v5 }
 0x1f0   :  { %v1096_v38 = vpop.f32.mrf.mxu3 }
 0x1f1   :  { %v1258_v20 = vadd.f32 %v1257_v11, %v1096_v38  ;;  %v564_v38 = vpop.permute.xlu0 %563 }
 0x1f2   :  { %v777_v40 = vpop.f32.mrf.mxu1  ;;  %v935_v18 = vpop.f32.mrf.mxu2 }
 0x1f3   :  { %v1624_v0 = vpack.c.bf16 %v1258_v20, %v1255_v22  ;;  %v936_v24 = vadd.f32 %v935_v18, %v774_v13  ;;  %v621_v22 = vmul.f32 %v564_v38, %v280_v1 }
 0x1f4   :  { %v1260_v26 = vpop.f32.mrf.mxu0 }
 0x1f5   :  { %1696 = vst [vmem:[#allocation7 + $0x58] sm:$0xff] %v1624_v0   ;;  %v1359_v46 = vadd.f32 %v2329_v39, %v936_v24  ;;  %824 = vmatmul.f32.gmra.mxu1 %v265_v17  ;;  %1146 = vmatmul.f32.gmra.mxu3 %v265_v17 }
 0x1f7   :  { %1407 = vst [vmem:[#allocation8 + $0xb8] sm:$0xff] %v1359_v46  ;;  %985 = vmatmul.f32.gmra.mxu2 %v616_v28  ;;  %1307 = vmatmul.f32.gmra.mxu0 %v616_v28  ;;  %v569_v46 = vpop.permute.xlu1 %568 }
 0x1f8   :  { %v1099_v16 = vpop.f32.mrf.mxu3 }
 0x1f9   :  { %v1261_v23 = vadd.f32 %v1260_v26, %v1099_v16 }
 0x1fa   :  { %v780_v30 = vpop.f32.mrf.mxu1  ;;  %v938_v14 = vpop.f32.mrf.mxu2 }
 0x1fb   :  { %v939_v33 = vadd.f32 %v938_v14, %v777_v40  ;;  %v283_v40 = vadd.f32 %v2400_v49, %v2312_v19  ;;  %v286_v19 = vadd.f32 %v2400_v49, %v2320_v8 }
 0x1fc   :  { %v1263_v36 = vpop.f32.mrf.mxu0 }
 0x1fd   :  { %v1360_v31 = vadd.f32 %v2329_v39, %v939_v33  ;;  %827 = vmatmul.f32.gmra.mxu1 %v268_v27  ;;  %1149 = vmatmul.f32.gmra.mxu3 %v268_v27 }
 0x1ff   :  { %1408 = vst [vmem:[#allocation8 + $0xc0] sm:$0xff] %v1360_v31  ;;  %988 = vmatmul.f32.gmra.mxu2 %v617_v15  ;;  %1310 = vmatmul.f32.gmra.mxu0 %v617_v15  ;;  %v574_v31 = vpop.permute.xlu2 %573 }
 0x200   :  { %v1102_v37 = vpop.f32.mrf.mxu3 }
 0x201   :  { %v1264_v35 = vadd.f32 %v1263_v36, %v1102_v37 }
 0x202   :  { %v783_v54 = vpop.f32.mrf.mxu1  ;;  %v941_v42 = vpop.f32.mrf.mxu2 }
 0x203   :  { %v1629_v43 = vpack.c.bf16 %v1264_v35, %v1261_v23  ;;  %v942_v25 = vadd.f32 %v941_v42, %v780_v30  ;;  %v622_v30 = vmul.f32 %v569_v46, %v283_v40 }
 0x204   :  { %v1266_v21 = vpop.f32.mrf.mxu0 }
 0x205   :  { %1697 = vst [vmem:[#allocation7 + $0x60] sm:$0xff] %v1629_v43   ;;  %v1361_v45 = vadd.f32 %v2329_v39, %v942_v25  ;;  %830 = vmatmul.f32.gmra.mxu1 %v271_v47  ;;  %1152 = vmatmul.f32.gmra.mxu3 %v271_v47  ;;  %v623_v47 = vmul.f32 %v574_v31, %v286_v19 }
 0x207   :  { %1409 = vst [vmem:[#allocation8 + $0xc8] sm:$0xff] %v1361_v45  ;;  %991 = vmatmul.f32.gmra.mxu2 %v618_v59  ;;  %1313 = vmatmul.f32.gmra.mxu0 %v618_v59 }
 0x208   :  { %v1105_v48 = vpop.f32.mrf.mxu3 }
 0x209   :  { %v1267_v62 = vadd.f32 %v1266_v21, %v1105_v48 }
 0x20a   :  { %v786_v51 = vpop.f32.mrf.mxu1  ;;  %v944_v2 = vpop.f32.mrf.mxu2 }
 0x20b   :  { %v945_v57 = vadd.f32 %v944_v2, %v783_v54 }
 0x20c   :  { %v1269_v52 = vpop.f32.mrf.mxu0 }
 0x20d   :  { %v1362_v58 = vadd.f32 %v2329_v39, %v945_v57  ;;  %833 = vmatmul.f32.gmra.mxu1 %v274_v44  ;;  %1155 = vmatmul.f32.gmra.mxu3 %v274_v44 }
 0x20f   :  { %1410 = vst [vmem:[#allocation8 + $0xd0] sm:$0xff] %v1362_v58  ;;  %994 = vmatmul.f32.gmra.mxu2 %v619_v56  ;;  %1316 = vmatmul.f32.gmra.mxu0 %v619_v56 }
 0x210   :  { %v1108_v29 = vpop.f32.mrf.mxu3 }
 0x211   :  { %v1270_v60 = vadd.f32 %v1269_v52, %v1108_v29 }
 0x212   :  { %v789_v53 = vpop.f32.mrf.mxu1  ;;  %v947_v32 = vpop.f32.mrf.mxu2 }
 0x213   :  { %v1634_v61 = vpack.c.bf16 %v1270_v60, %v1267_v62  ;;  %v948_v63 = vadd.f32 %v947_v32, %v786_v51  ;;  %v2434_v62 = vld [vmem:[%s2465_s5] ss:$0 sm:$0xff]  ;;  %s1886_s5 = smov [#allocation7]  }
 0x214   :  { %v1272_v4 = vpop.f32.mrf.mxu0  ;;  %s1532_s26 = sshll.u32 %s1886_s5, 4  ;;  %s1533_s26 = int_to_ptr.vmem [resolvable:$true] %s1532_s26 }
 0x215   :  { %1698 = vst [vmem:[#allocation7 + $0x68] sm:$0xff] %v1634_v61   ;;  %v1363_v13 = vadd.f32 %v2329_v39, %v948_v63  ;;  %836 = vmatmul.f32.gmra.mxu1 %v277_v3  ;;  %1158 = vmatmul.f32.gmra.mxu3 %v277_v3 }
 0x217   :  { %1411 = vst [vmem:[#allocation8 + $0xd8] sm:$0xff] %v1363_v13  ;;  %997 = vmatmul.f32.gmra.mxu2 %v620_v7  ;;  %1319 = vmatmul.f32.gmra.mxu0 %v620_v7 }
 0x218   :  { %v1111_v9 = vpop.f32.mrf.mxu3 }
 0x219   :  { %v1273_v18 = vadd.f32 %v1272_v4, %v1111_v9 }
 0x21a   :  { %v792_v11 = vpop.f32.mrf.mxu1  ;;  %v950_v5 = vpop.f32.mrf.mxu2 }
 0x21b   :  { %v951_v55 = vadd.f32 %v950_v5, %v789_v53 }
 0x21c   :  { %v1275_v17 = vpop.f32.mrf.mxu0 }
 0x21d   :  { %v1364_v6 = vadd.f32 %v2329_v39, %v951_v55  ;;  %839 = vmatmul.f32.gmra.mxu1 %v280_v1  ;;  %1161 = vmatmul.f32.gmra.mxu3 %v280_v1 }
 0x21f   :  { %1412 = vst [vmem:[#allocation8 + $0xe0] sm:$0xff] %v1364_v6  ;;  %1000 = vmatmul.f32.gmra.mxu2 %v621_v22  ;;  %1322 = vmatmul.f32.gmra.mxu0 %v621_v22 }
 0x220   :  { %v1114_v20 = vpop.f32.mrf.mxu3 }
 0x221   :  { %v1276_v0 = vadd.f32 %v1275_v17, %v1114_v20 }
 0x222   :  { %v795_v10 = vpop.f32.mrf.mxu1  ;;  %v953_v24 = vpop.f32.mrf.mxu2 }
 0x223   :  { %v1639_v26 = vpack.c.bf16 %v1276_v0, %v1273_v18  ;;  %v954_v28 = vadd.f32 %v953_v24, %v792_v11 }
 0x224   :  { %v1278_v16 = vpop.f32.mrf.mxu0 }
 0x225   :  { %1699 = vst [vmem:[#allocation7 + $0x70] sm:$0xff] %v1639_v26   ;;  %v1365_v27 = vadd.f32 %v2329_v39, %v954_v28  ;;  %842 = vmatmul.f32.gmra.mxu1 %v283_v40  ;;  %1164 = vmatmul.f32.gmra.mxu3 %v283_v40 }
 0x227   :  { %1413 = vst [vmem:[#allocation8 + $0xe8] sm:$0xff] %v1365_v27  ;;  %1003 = vmatmul.f32.gmra.mxu2 %v622_v30  ;;  %1325 = vmatmul.f32.gmra.mxu0 %v622_v30 }
 0x228   :  { %v1117_v14 = vpop.f32.mrf.mxu3 }
 0x229   :  { %v1279_v23 = vadd.f32 %v1278_v16, %v1117_v14 }
 0x22a   :  { %v798_v33 = vpop.f32.mrf.mxu1  ;;  %v956_v34 = vpop.f32.mrf.mxu2 }
 0x22b   :  { %v957_v36 = vadd.f32 %v956_v34, %v795_v10 }
 0x22c   :  { %v1281_v15 = vpop.f32.mrf.mxu0 }
 0x22d   :  { %v1366_v37 = vadd.f32 %v2329_v39, %v957_v36  ;;  %845 = vmatmul.f32.gmra.mxu1 %v286_v19  ;;  %1167 = vmatmul.f32.gmra.mxu3 %v286_v19 }
 0x22f   :  { %1414 = vst [vmem:[#allocation8 + $0xf0] sm:$0xff] %v1366_v37  ;;  %1006 = vmatmul.f32.gmra.mxu2 %v623_v47  ;;  %1328 = vmatmul.f32.gmra.mxu0 %v623_v47 }
 0x230   :  { %v1120_v41 = vpop.f32.mrf.mxu3 }
 0x231   :  { %v1282_v35 = vadd.f32 %v1281_v15, %v1120_v41 }
 0x232   :  { %v801_v54 = vpop.f32.mrf.mxu1  ;;  %v959_v42 = vpop.f32.mrf.mxu2 }
 0x233   :  { %v1644_v43 = vpack.c.bf16 %v1282_v35, %v1279_v23  ;;  %v960_v8 = vadd.f32 %v959_v42, %v798_v33 }
 0x234   :  { %v1284_v49 = vpop.f32.mrf.mxu0 }
 0x235   :  { %1700 = vst [vmem:[#allocation7 + $0x78] sm:$0xff] %v1644_v43   ;;  %v1367_v25 = vadd.f32 %v2329_v39, %v960_v8 }
 0x237   :  { %1415 = vst [vmem:[#allocation8 + $0xf8] sm:$0xff] %v1367_v25 }
 0x238   :  { %v1123_v21 = vpop.f32.mrf.mxu3 }
 0x239   :  { %v1285_v2 = vadd.f32 %v1284_v49, %v1123_v21 }
 0x23a   :  { %v804_v59 = vpop.f32.mrf.mxu1  ;;  %v962_v45 = vpop.f32.mrf.mxu2 }
 0x23b   :  { %v963_v48 = vadd.f32 %v962_v45, %v801_v54 }
 0x23c   :  { %v1287_v44 = vpop.f32.mrf.mxu0 }
 0x23d   :  { %v1368_v50 = vadd.f32 %v2329_v39, %v963_v48 }
 0x23f   :  { %1416 = vst [vmem:[#allocation8 + $0x100] sm:$0xff] %v1368_v50 }
 0x240   :  { %v1126_v51 = vpop.f32.mrf.mxu3 }
 0x241   :  { %v1288_v57 = vadd.f32 %v1287_v44, %v1126_v51 }
 0x242   :  { %v807_v52 = vpop.f32.mrf.mxu1  ;;  %v965_v56 = vpop.f32.mrf.mxu2 }
 0x243   :  { %v1649_v58 = vpack.c.bf16 %v1288_v57, %v1285_v2  ;;  %v966_v29 = vadd.f32 %v965_v56, %v804_v59 }
 0x244   :  { %v1290_v3 = vpop.f32.mrf.mxu0 }
 0x245   :  { %1701 = vst [vmem:[#allocation7 + $0x80] sm:$0xff] %v1649_v58   ;;  %v1369_v60 = vadd.f32 %v2434_v62, %v966_v29 }
 0x247   :  { %1417 = vst [vmem:[#allocation8 + $0x108] sm:$0xff] %v1369_v60 }
 0x248   :  { %v1129_v53 = vpop.f32.mrf.mxu3 }
 0x249   :  { %v1291_v13 = vadd.f32 %v1290_v3, %v1129_v53 }
 0x24a   :  { %v810_v39 = vpop.f32.mrf.mxu1  ;;  %v968_v32 = vpop.f32.mrf.mxu2 }
 0x24b   :  { %v969_v61 = vadd.f32 %v968_v32, %v807_v52 }
 0x24c   :  { %v1293_v63 = vpop.f32.mrf.mxu0 }
 0x24d   :  { %v1370_v12 = vadd.f32 %v2434_v62, %v969_v61 }
 0x24f   :  { %1418 = vst [vmem:[#allocation8 + $0x110] sm:$0xff] %v1370_v12 }
 0x250   :  { %v1132_v4 = vpop.f32.mrf.mxu3 }
 0x251   :  { %v1294_v7 = vadd.f32 %v1293_v63, %v1132_v4 }
 0x252   :  { %v813_v9 = vpop.f32.mrf.mxu1  ;;  %v971_v1 = vpop.f32.mrf.mxu2 }
 0x253   :  { %v1654_v11 = vpack.c.bf16 %v1294_v7, %v1291_v13  ;;  %v972_v5 = vadd.f32 %v971_v1, %v810_v39 }
 0x254   :  { %v1296_v55 = vpop.f32.mrf.mxu0 }
 0x255   :  { %1702 = vst [vmem:[#allocation7 + $0x88] sm:$0xff] %v1654_v11   ;;  %v1371_v38 = vadd.f32 %v2434_v62, %v972_v5 }
 0x257   :  { %1419 = vst [vmem:[#allocation8 + $0x118] sm:$0xff] %v1371_v38 }
 0x258   :  { %v1135_v17 = vpop.f32.mrf.mxu3 }
 0x259   :  { %v1297_v10 = vadd.f32 %v1296_v55, %v1135_v17 }
 0x25a   :  { %v816_v6 = vpop.f32.mrf.mxu1  ;;  %v974_v22 = vpop.f32.mrf.mxu2 }
 0x25b   :  { %v975_v20 = vadd.f32 %v974_v22, %v813_v9 }
 0x25c   :  { %v1299_v40 = vpop.f32.mrf.mxu0 }
 0x25d   :  { %v1372_v18 = vadd.f32 %v2434_v62, %v975_v20 }
 0x25f   :  { %1420 = vst [vmem:[#allocation8 + $0x120] sm:$0xff] %v1372_v18 }
 0x260   :  { %v1138_v0 = vpop.f32.mrf.mxu3 }
 0x261   :  { %v1300_v24 = vadd.f32 %v1299_v40, %v1138_v0 }
 0x262   :  { %v819_v26 = vpop.f32.mrf.mxu1  ;;  %v977_v28 = vpop.f32.mrf.mxu2 }
 0x263   :  { %v1659_v46 = vpack.c.bf16 %v1300_v24, %v1297_v10  ;;  %v978_v16 = vadd.f32 %v977_v28, %v816_v6 }
 0x264   :  { %v1302_v27 = vpop.f32.mrf.mxu0 }
 0x265   :  { %1703 = vst [vmem:[#allocation7 + $0x90] sm:$0xff] %v1659_v46   ;;  %v1373_v30 = vadd.f32 %v2434_v62, %v978_v16 }
 0x267   :  { %1421 = vst [vmem:[#allocation8 + $0x128] sm:$0xff] %v1373_v30 }
 0x268   :  { %v1141_v14 = vpop.f32.mrf.mxu3 }
 0x269   :  { %v1303_v37 = vadd.f32 %v1302_v27, %v1141_v14 }
 0x26a   :  { %v822_v19 = vpop.f32.mrf.mxu1  ;;  %v980_v33 = vpop.f32.mrf.mxu2 }
 0x26b   :  { %v981_v34 = vadd.f32 %v980_v33, %v819_v26 }
 0x26c   :  { %v1305_v36 = vpop.f32.mrf.mxu0 }
 0x26d   :  { %v1374_v31 = vadd.f32 %v2434_v62, %v981_v34 }
 0x26f   :  { %1422 = vst [vmem:[#allocation8 + $0x130] sm:$0xff] %v1374_v31 }
 0x270   :  { %v1144_v15 = vpop.f32.mrf.mxu3 }
 0x271   :  { %v1306_v47 = vadd.f32 %v1305_v36, %v1144_v15 }
 0x272   :  { %v825_v41 = vpop.f32.mrf.mxu1  ;;  %v983_v23 = vpop.f32.mrf.mxu2 }
 0x273   :  { %v1664_v35 = vpack.c.bf16 %v1306_v47, %v1303_v37  ;;  %v984_v54 = vadd.f32 %v983_v23, %v822_v19 }
 0x274   :  { %v1308_v42 = vpop.f32.mrf.mxu0 }
 0x275   :  { %1704 = vst [vmem:[#allocation7 + $0x98] sm:$0xff] %v1664_v35   ;;  %v1375_v43 = vadd.f32 %v2434_v62, %v984_v54 }
 0x277   :  { %1423 = vst [vmem:[#allocation8 + $0x138] sm:$0xff] %v1375_v43 }
 0x278   :  { %v1147_v8 = vpop.f32.mrf.mxu3 }
 0x279   :  { %v1309_v44 = vadd.f32 %v1308_v42, %v1147_v8 }
 0x27a   :  { %v828_v49 = vpop.f32.mrf.mxu1  ;;  %v986_v25 = vpop.f32.mrf.mxu2 }
 0x27b   :  { %v987_v21 = vadd.f32 %v986_v25, %v825_v41 }
 0x27c   :  { %v1311_v59 = vpop.f32.mrf.mxu0 }
 0x27d   :  { %v1376_v45 = vadd.f32 %v2434_v62, %v987_v21 }
 0x27f   :  { %1424 = vst [vmem:[#allocation8 + $0x140] sm:$0xff] %v1376_v45 }
 0x280   :  { %v1150_v48 = vpop.f32.mrf.mxu3 }
 0x281   :  { %v1312_v50 = vadd.f32 %v1311_v59, %v1150_v48 }
 0x282   :  { %v831_v51 = vpop.f32.mrf.mxu1  ;;  %v989_v2 = vpop.f32.mrf.mxu2 }
 0x283   :  { %v1669_v57 = vpack.c.bf16 %v1312_v50, %v1309_v44  ;;  %v990_v52 = vadd.f32 %v989_v2, %v828_v49 }
 0x284   :  { %v1314_v56 = vpop.f32.mrf.mxu0 }
 0x285   :  { %1705 = vst [vmem:[#allocation7 + $0xa0] sm:$0xff] %v1669_v57   ;;  %v1377_v58 = vadd.f32 %v2434_v62, %v990_v52 }
 0x287   :  { %1425 = vst [vmem:[#allocation8 + $0x148] sm:$0xff] %v1377_v58 }
 0x288   :  { %v1153_v29 = vpop.f32.mrf.mxu3 }
 0x289   :  { %v1315_v63 = vadd.f32 %v1314_v56, %v1153_v29 }
 0x28a   :  { %v834_v3 = vpop.f32.mrf.mxu1  ;;  %v992_v60 = vpop.f32.mrf.mxu2 }
 0x28b   :  { %v993_v53 = vadd.f32 %v992_v60, %v831_v51 }
 0x28c   :  { %v1317_v39 = vpop.f32.mrf.mxu0 }
 0x28d   :  { %v1378_v32 = vadd.f32 %v2434_v62, %v993_v53 }
 0x28f   :  { %1426 = vst [vmem:[#allocation8 + $0x150] sm:$0xff] %v1378_v32 }
 0x290   :  { %v1156_v61 = vpop.f32.mrf.mxu3 }
 0x291   :  { %v1318_v12 = vadd.f32 %v1317_v39, %v1156_v61 }
 0x292   :  { %v995_v4 = vpop.f32.mrf.mxu2  ;;  %v837_v9 = vpop.f32.mrf.mxu1 }
 0x293   :  { %v1674_v13 = vpack.c.bf16 %v1318_v12, %v1315_v63  ;;  %v996_v7 = vadd.f32 %v995_v4, %v834_v3 }
 0x294   :  { %v1320_v1 = vpop.f32.mrf.mxu0 }
 0x295   :  { %1706 = vst [vmem:[#allocation7 + $0xa8] sm:$0xff] %v1674_v13   ;;  %v1379_v11 = vadd.f32 %v2434_v62, %v996_v7 }
 0x297   :  { %1427 = vst [vmem:[#allocation8 + $0x158] sm:$0xff] %v1379_v11 }
 0x298   :  { %v1159_v5 = vpop.f32.mrf.mxu3 }
 0x299   :  { %v1321_v40 = vadd.f32 %v1320_v1, %v1159_v5 }
 0x29a   :  { %v998_v55 = vpop.f32.mrf.mxu2  ;;  %v840_v22 = vpop.f32.mrf.mxu1 }
 0x29b   :  { %v999_v38 = vadd.f32 %v998_v55, %v837_v9 }
 0x29c   :  { %v1323_v17 = vpop.f32.mrf.mxu0 }
 0x29d   :  { %v1380_v6 = vadd.f32 %v2434_v62, %v999_v38 }
 0x29f   :  { %1428 = vst [vmem:[#allocation8 + $0x160] sm:$0xff] %v1380_v6 }
 0x2a0   :  { %v1162_v20 = vpop.f32.mrf.mxu3 }
 0x2a1   :  { %v1324_v18 = vadd.f32 %v1323_v17, %v1162_v20 }
 0x2a2   :  { %v1001_v0 = vpop.f32.mrf.mxu2  ;;  %v843_v46 = vpop.f32.mrf.mxu1 }
 0x2a3   :  { %v1679_v10 = vpack.c.bf16 %v1324_v18, %v1321_v40  ;;  %v1002_v24 = vadd.f32 %v1001_v0, %v840_v22 }
 0x2a4   :  { %v1326_v28 = vpop.f32.mrf.mxu0 }
 0x2a5   :  { %1707 = vst [vmem:[#allocation7 + $0xb0] sm:$0xff] %v1679_v10   ;;  %v1381_v26 = vadd.f32 %v2434_v62, %v1002_v24 }
 0x2a7   :  { %1429 = vst [vmem:[#allocation8 + $0x168] sm:$0xff] %v1381_v26 }
 0x2a8   :  { %v1165_v16 = vpop.f32.mrf.mxu3 }
 0x2a9   :  { %v1327_v34 = vadd.f32 %v1326_v28, %v1165_v16 }
 0x2aa   :  { %v1004_v27 = vpop.f32.mrf.mxu2  ;;  %v846_v31 = vpop.f32.mrf.mxu1 }
 0x2ab   :  { %v1005_v30 = vadd.f32 %v1004_v27, %v843_v46 }
 0x2ac   :  { %v1329_v19 = vpop.f32.mrf.mxu0 }
 0x2ad   :  { %v1382_v14 = vadd.f32 %v2434_v62, %v1005_v30 }
 0x2af   :  { %1430 = vst [vmem:[#allocation8 + $0x170] sm:$0xff] %v1382_v14 }
 0x2b0   :  { %v1168_v33 = vpop.f32.mrf.mxu3 }
 0x2b1   :  { %v1330_v36 = vadd.f32 %v1329_v19, %v1168_v33 }
 0x2b2   :  { %v1007_v15 = vpop.f32.mrf.mxu2 }
 0x2b3   :  { %v1684_v37 = vpack.c.bf16 %v1330_v36, %v1327_v34  ;;  %v1008_v47 = vadd.f32 %v1007_v15, %v846_v31 }
 0x2b5   :  { %1708 = vst [vmem:[#allocation7 + $0xb8] sm:$0xff] %v1684_v37   ;;  %v1383_v41 = vadd.f32 %v2434_v62, %v1008_v47 }
 0x2b6   :  { %1540 = dma.vmem_to_hbm [thread:$0]  %s1533_s26, 3072, %s1535_s29, [#allocation4], %s1888_s6, %s1888_s6, %s1889_s2  }
 0x2b7   :  { %1431 = vst [vmem:[#allocation8 + $0x178] sm:$0xff] %v1383_v41 }
 0x2b8   :  { %1553 = dma.vmem_to_hbm [thread:$0]  %s1546_s8, 6144, %s1548_s13, [#allocation9], %s1880_s9, %s1880_s9, %s1881_s10  }
 0x2b9   :  { %1875 = dma.done.wait [#allocation4], 3072  }
 0x2ba   :  { %1876 = vsyncadd [#allocation4], 4294964224 }
 0x2bb   :  { %1877 = dma.done.wait [#allocation9], 6144  }
 0x2bc   :  { %1878 = vsyncadd [#allocation9], 4294961152 }
 0x2bd   :  { %1562 = vsyncpa [#allocation3], 1 }
 0x2be   :  { %1563 = vsyncpa [#allocation6], 1 }
 0x2bf   :  { %1564 = vsyncpa [#allocation4], 1 }
 0x2c0   :  { %1565 = vsyncpa [#allocation9], 1 }

</bundles_post_ra>
